<compile_context>
chip_gen: v7x
topology: tpu7x:2x2x1
jax: 0.10.0
libtpu: 0.0.40
codegen_flags: <defaults>
</compile_context>

<pallas_src>
import jax
import jax.numpy as jnp
from jax.experimental import pallas as pl
from jax.experimental.pallas import tpu as pltpu


def _vmem_limit_bytes():
    # ~3/4 of physical VMEM, capped at 96 MiB: v5e/v6e -> 96 MiB, v7x -> 48 MiB.
    try:
        phys = pltpu.get_tpu_info().vmem_capacity_bytes
    except Exception:
        phys = 64 * 1024 * 1024
    return min(int(phys * 3 // 4), 96 * 1024 * 1024)


VMEM_LIMIT = _vmem_limit_bytes()


def _round_up(x, m):
    return ((x + m - 1) // m) * m


# ---------------------------------------------------------------------------
# Kernel A: fused projection + linear skip + attention-logit matmul.
#   x_tile [TM, Fin] @ Wf [Fin, H*Dh + OUT] -> hw (head-major store), lin
#   hw (bf16)        @ A_pack [H*Dh, 2H]    -> alphas [TM, 2H]
# ---------------------------------------------------------------------------
def make_proj_kernel(H, dh):
    hdh = H * dh

    def kernel(x_ref, wf_ref, ap_ref, hw_ref, lin_ref, al_ref):
        xb = x_ref[...].astype(jnp.bfloat16)
        r = jnp.dot(xb, wf_ref[...], preferred_element_type=jnp.float32)
        lin_ref[...] = r[:, hdh:]
        hwb = r[:, :hdh].astype(jnp.bfloat16)
        # Head-major store [H, TM, Dh]: H lane-aligned slab stores, no transpose.
        for h in range(H):
            hw_ref[h] = hwb[:, h * dh:(h + 1) * dh]
        al_ref[...] = jnp.dot(hwb, ap_ref[...],
                              preferred_element_type=jnp.float32)

    return kernel


# ---------------------------------------------------------------------------
# Kernel B: masked softmax attention + aggregation for one (row-tile, head).
# ---------------------------------------------------------------------------
def make_attn_kernel(H, concat, apply_elu, neg_slope=0.2):
    inv_heads = 1.0 / float(H)

    def elu(y):
        # clamp the unselected branch so exp() never overflows
        return jnp.where(y > 0, y, jnp.exp(jnp.minimum(y, 0.0)) - 1.0)

    def kernel(adjb_ref, asrc_ref, adst_ref, hw_ref, lin_ref, b_ref, o_ref):
        h = pl.program_id(1)

        a_src = asrc_ref[0]                                 # [1, N]  f32
        a_dst = adst_ref[0]                                 # [TM, 1] f32

        e = a_dst + a_src                                   # [TM, N]
        e = jnp.maximum(e, neg_slope * e)                   # LeakyReLU (slope<1)
        e = e + adjb_ref[...].astype(jnp.float32)           # additive adj bias

        m = jnp.max(e, axis=-1, keepdims=True)
        p = jnp.exp(e - m)                                  # unnormalized weights
        s = jnp.sum(p, axis=-1, keepdims=True)              # [TM, 1]

        agg = jnp.dot(p.astype(jnp.bfloat16), hw_ref[0],
                      preferred_element_type=jnp.float32)   # [TM, Dh]
        gat = agg * pl.reciprocal(s, approx=True)           # deferred softmax norm

        if concat:
            y = gat + b_ref[...] + lin_ref[...]
            if apply_elu:
                y = elu(y)
            o_ref[...] = y.astype(o_ref.dtype)
        else:
            @pl.when(h == 0)
            def _init():
                o_ref[...] = jnp.zeros_like(o_ref)

            o_ref[...] += gat * inv_heads

            @pl.when(h == H - 1)
            def _finalize():
                y = o_ref[...] + b_ref[...] + lin_ref[...]
                if apply_elu:
                    y = elu(y)
                o_ref[...] = y

    return kernel


# ---------------------------------------------------------------------------
# One network layer:  maybe_elu( GATConv(x, adj) + Linear(x) )
# ---------------------------------------------------------------------------
def gat_layer(x, adj_bias, lp, *, apply_elu, tm=256):
    N, fin = x.shape
    H, dh, out, concat = lp["H"], lp["dh"], lp["out"], lp["concat"]
    hdh = H * dh
    assert N % tm == 0, "N must be a multiple of the row tile"
    ntiles = N // tm

    # ---- Kernel A: projection + skip + attention logits (row-tiled) ----
    hw3, lin, alphas = pl.pallas_call(
        make_proj_kernel(H, dh),
        out_shape=(jax.ShapeDtypeStruct((H, N, dh), jnp.bfloat16),
                   jax.ShapeDtypeStruct((N, out), jnp.float32),
                   jax.ShapeDtypeStruct((N, 2 * H), jnp.float32)),
        grid=(ntiles,),
        in_specs=[pl.BlockSpec((tm, fin), lambda i: (i, 0)),
                  pl.BlockSpec((fin, hdh + out), lambda i: (0, 0)),
                  pl.BlockSpec((hdh, 2 * H), lambda i: (0, 0))],
        out_specs=(pl.BlockSpec((H, tm, dh), lambda i: (0, i, 0)),
                   pl.BlockSpec((tm, out), lambda i: (i, 0)),
                   pl.BlockSpec((tm, 2 * H), lambda i: (i, 0))),
        compiler_params=pltpu.CompilerParams(
            dimension_semantics=("parallel",),
            vmem_limit_bytes=VMEM_LIMIT),
    )(x, lp["wf"], lp["ap"])

    # ---- tiny plain-JAX glue: [N, 2H] -> [H,1,N] (src) and [H,N,1] (dst) ----
    al_t = jnp.transpose(alphas)                 # [2H, N]
    asrc_t = al_t[:H].reshape(H, 1, N)           # per-head row vector
    adst_t = al_t[H:].reshape(H, N, 1)           # per-head column vector

    # ---- Kernel B: attention + aggregation, grid over (row tiles, heads) ----
    if concat:
        lin_idx = lambda i, h: (i, h)
        b_idx = lambda i, h: (0, h)
        o_idx = lambda i, h: (i, h)
        head_sem = "parallel"
        out_dtype = jnp.bfloat16                 # inter-layer activations bf16
    else:
        lin_idx = lambda i, h: (i, 0)
        b_idx = lambda i, h: (0, 0)
        o_idx = lambda i, h: (i, 0)
        head_sem = "arbitrary"
        out_dtype = jnp.float32

    y = pl.pallas_call(
        make_attn_kernel(H, concat, apply_elu),
        out_shape=jax.ShapeDtypeStruct((N, out), out_dtype),
        grid=(ntiles, H),
        in_specs=[pl.BlockSpec((tm, N), lambda i, h: (i, 0)),       # adj bias tile
                  pl.BlockSpec((1, 1, N), lambda i, h: (h, 0, 0)),  # alpha_src
                  pl.BlockSpec((1, tm, 1), lambda i, h: (h, i, 0)), # alpha_dst col
                  pl.BlockSpec((1, N, dh), lambda i, h: (h, 0, 0)), # per-head hw
                  pl.BlockSpec((tm, dh), lin_idx),                  # linear skip
                  pl.BlockSpec((1, dh), b_idx)],                    # fused bias
        out_specs=pl.BlockSpec((tm, dh), o_idx),
        compiler_params=pltpu.CompilerParams(
            dimension_semantics=("parallel", head_sem),
            vmem_limit_bytes=VMEM_LIMIT),
    )(adj_bias, asrc_t, adst_t, hw3, lin, lp["bias"])
    return y


# ---------------------------------------------------------------------------
# Parameter construction (deterministic, synthetic), fused/padded host-side.
# ---------------------------------------------------------------------------
def _rand(k, shape, scale=0.1):
    return (scale * jax.random.normal(k, shape)).astype(jnp.float32)


def make_layer_params(key, fin, H, dh_raw, *, concat):
    ks = jax.random.split(key, 6)
    if concat:
        assert dh_raw % 128 == 0, "per-head hidden size must be lane-dense"
        dh = dh_raw
    else:
        dh = _round_up(dh_raw, 128)              # pad classes to 128 lanes
    out = H * dh if concat else dh
    pad = dh - dh_raw

    # GATConv weight, per-head blocks padded to dh lanes
    w = _rand(ks[0], (fin, H, dh_raw))
    w = jnp.pad(w, ((0, 0), (0, 0), (0, pad))).reshape(fin, H * dh)
    asrc = jnp.pad(_rand(ks[1], (H, dh_raw)), ((0, 0), (0, pad)))
    adst = jnp.pad(_rand(ks[2], (H, dh_raw)), ((0, 0), (0, pad)))

    out_raw = H * dh_raw if concat else dh_raw
    gb = _rand(ks[3], (out_raw,))
    lw = _rand(ks[4], (fin, out_raw))            # Linear skip, [in, out]
    lb = _rand(ks[5], (out_raw,))
    opad = out - out_raw
    gb = jnp.pad(gb, (0, opad))
    lw = jnp.pad(lw, ((0, 0), (0, opad)))
    lb = jnp.pad(lb, (0, opad))

    # Fused projection weight [Fin, H*dh + out] (bf16 MXU operand)
    wf = jnp.concatenate([w, lw], axis=1).astype(jnp.bfloat16)

    # Block-diagonal attention packing [H*dh, 2H]: cols 0..H-1 = a_src,
    # cols H..2H-1 = a_dst -> one matmul yields all heads' logits.
    ap = jnp.zeros((H * dh, 2 * H), jnp.float32)
    for h in range(H):
        ap = ap.at[h * dh:(h + 1) * dh, h].set(asrc[h])
        ap = ap.at[h * dh:(h + 1) * dh, H + h].set(adst[h])
    ap = ap.astype(jnp.bfloat16)

    bias = (gb + lb).reshape(1, out).astype(jnp.float32)   # fused GAT+Linear bias
    return dict(wf=wf, ap=ap, bias=bias, H=H, dh=dh, out=out, concat=concat)


def net_forward(x, adj_bias, L1, L2, L3, *, num_classes, tm):
    x = gat_layer(x, adj_bias, L1, apply_elu=True, tm=tm)   # elu(conv1 + lin1)
    x = gat_layer(x, adj_bias, L2, apply_elu=True, tm=tm)   # elu(conv2 + lin2)
    x = gat_layer(x, adj_bias, L3, apply_elu=False, tm=tm)  # conv3 + lin3 (mean heads)
    return x[:, :num_classes]                               # drop lane padding


if __name__ == "__main__":
    # Small synthetic shapes standing in for the PPI dataset dims.
    N = 512                # nodes; N/TM >= 2 keeps the row axis shardable (v7x)
    NUM_FEATURES = 50      # PPI: train_dataset.num_features
    FIN_PAD = 128          # layer-1 feature dim zero-padded to a lane-dense size
    HID = 128              # per-head hidden size (module uses 256)
    HEADS12 = 4
    NUM_CLASSES = 16       # PPI has 121; small test size (padded to 128 lanes)
    HEADS3 = 6
    E = 2048               # edges
    TM = 256               # destination-row tile (fills the 256-wide MXU)

    key = jax.random.PRNGKey(0)
    k_x, k_src, k_dst, k_params = jax.random.split(key, 4)

    x = jax.random.normal(k_x, (N, NUM_FEATURES), dtype=jnp.float32)
    x = jnp.pad(x, ((0, 0), (0, FIN_PAD - NUM_FEATURES))).astype(jnp.bfloat16)

    src = jax.random.randint(k_src, (E,), 0, N)
    dst = jax.random.randint(k_dst, (E,), 0, N)
    edge_index = jnp.stack([src, dst])  # [2, E], PyG convention [source, target]

    # TODO(synk): sparse edge_index -> dense additive adjacency bias is plain-JAX
    # glue (scatter has no clean Pallas TPU equivalent).  adj_bias[i, j] = 0 iff
    # edge j -> i or self-loop (GATConv add_self_loops=True), else -1e9.  bf16.
    adj = jnp.zeros((N, N), dtype=jnp.float32)
    adj = adj.at[edge_index[1], edge_index[0]].set(1.0)
    adj = adj.at[jnp.arange(N), jnp.arange(N)].set(1.0)
    adj_bias = jnp.where(adj > 0, 0.0, -1e9).astype(jnp.bfloat16)

    k1, k2, k3 = jax.random.split(k_params, 3)
    L1 = make_layer_params(k1, FIN_PAD, HEADS12, HID, concat=True)
    L2 = make_layer_params(k2, HEADS12 * HID, HEADS12, HID, concat=True)
    L3 = make_layer_params(k3, HEADS12 * HID, HEADS3, NUM_CLASSES, concat=False)

    out = net_forward(x, adj_bias, L1, L2, L3, num_classes=NUM_CLASSES, tm=TM)
    out = jax.block_until_ready(out)

    assert out.shape == (N, NUM_CLASSES)
    assert bool(jnp.all(jnp.isfinite(out)))
    print("KERNEL_OK")
</pallas_src>

<mosaic_0001>
module attributes {stable_mosaic.version = 11 : i64} {
  func.func @kernel(%arg0: i32, %arg1: memref<256x128xbf16, #tpu.memory_space<vmem>>, %arg2: memref<128x1024xbf16, #tpu.memory_space<vmem>>, %arg3: memref<512x8xbf16, #tpu.memory_space<vmem>>, %arg4: memref<4x256x128xbf16, #tpu.memory_space<vmem>>, %arg5: memref<256x512xf32, #tpu.memory_space<vmem>>, %arg6: memref<256x8xf32, #tpu.memory_space<vmem>>) attributes {dimension_semantics = [#tpu.dimension_semantics<parallel>], iteration_bounds = array<i64: 2>, scalar_prefetch = 0 : i64, scratch_operands = 0 : i64, tpu.core_type = #tpu.core_type<tc>, window_params = [{transform_indices = @transform_0, window_bounds = array<i64: 256, 128>}, {pipeline_mode = #tpu.pipeline_mode<synchronous>, transform_indices = @transform_1, window_bounds = array<i64: 128, 1024>}, {pipeline_mode = #tpu.pipeline_mode<synchronous>, transform_indices = @transform_2, window_bounds = array<i64: 512, 8>}, {transform_indices = @transform_3, window_bounds = array<i64: 4, 256, 128>}, {transform_indices = @transform_4, window_bounds = array<i64: 256, 512>}, {transform_indices = @transform_5, window_bounds = array<i64: 256, 8>}]} {
    %c0 = arith.constant 0 : index
    %c0_0 = arith.constant 0 : index
    %0 = vector.load %arg1[%c0, %c0_0] : memref<256x128xbf16, #tpu.memory_space<vmem>>, vector<256x128xbf16>
    %c0_1 = arith.constant 0 : index
    %c0_2 = arith.constant 0 : index
    %1 = vector.load %arg2[%c0_1, %c0_2] : memref<128x1024xbf16, #tpu.memory_space<vmem>>, vector<128x1024xbf16>
    %cst = arith.constant dense<0.000000e+00> : vector<256x1024xf32>
    %2 = tpu.matmul %0, %1, %cst {dimension_numbers = #tpu.dot_dimension_numbers<[1], [0], [0], [1], [0, 0, 1, 1], [], []>} : vector<256x128xbf16>, vector<128x1024xbf16>, vector<256x1024xf32> -> vector<256x1024xf32>
    %3 = vector.extract_strided_slice %2 {offsets = [0, 512], sizes = [256, 512], strides = [1, 1]} : vector<256x1024xf32> to vector<256x512xf32>
    %c0_3 = arith.constant 0 : index
    %c0_4 = arith.constant 0 : index
    %4 = vector.load %arg5[%c0_3, %c0_4] : memref<256x512xf32, #tpu.memory_space<vmem>>, vector<256x512xf32>
    tpu.vector_store %arg5[%c0_3, %c0_4], %3 {strides = array<i32>} : memref<256x512xf32, #tpu.memory_space<vmem>>, vector<256x512xf32>,
    %5 = vector.extract_strided_slice %2 {offsets = [0, 0], sizes = [256, 512], strides = [1, 1]} : vector<256x1024xf32> to vector<256x512xf32>
    %6 = arith.truncf %5 : vector<256x512xf32> to vector<256x512xbf16>
    %7 = vector.extract_strided_slice %6 {offsets = [0, 0], sizes = [256, 128], strides = [1, 1]} : vector<256x512xbf16> to vector<256x128xbf16>
    %c0_5 = arith.constant 0 : index
    %c0_6 = arith.constant 0 : index
    %c0_7 = arith.constant 0 : index
    %8 = vector.load %arg4[%c0_5, %c0_6, %c0_7] : memref<4x256x128xbf16, #tpu.memory_space<vmem>>, vector<1x256x128xbf16>
    %9 = vector.shape_cast %8 : vector<1x256x128xbf16> to vector<256x128xbf16>
    %10 = vector.shape_cast %7 : vector<256x128xbf16> to vector<1x256x128xbf16>
    tpu.vector_store %arg4[%c0_5, %c0_6, %c0_7], %10 {strides = array<i32>} : memref<4x256x128xbf16, #tpu.memory_space<vmem>>, vector<1x256x128xbf16>,
    %11 = vector.extract_strided_slice %6 {offsets = [0, 128], sizes = [256, 128], strides = [1, 1]} : vector<256x512xbf16> to vector<256x128xbf16>
    %c1 = arith.constant 1 : index
    %c0_8 = arith.constant 0 : index
    %c0_9 = arith.constant 0 : index
    %12 = vector.load %arg4[%c1, %c0_8, %c0_9] : memref<4x256x128xbf16, #tpu.memory_space<vmem>>, vector<1x256x128xbf16>
    %13 = vector.shape_cast %12 : vector<1x256x128xbf16> to vector<256x128xbf16>
    %14 = vector.shape_cast %11 : vector<256x128xbf16> to vector<1x256x128xbf16>
    tpu.vector_store %arg4[%c1, %c0_8, %c0_9], %14 {strides = array<i32>} : memref<4x256x128xbf16, #tpu.memory_space<vmem>>, vector<1x256x128xbf16>,
    %15 = vector.extract_strided_slice %6 {offsets = [0, 256], sizes = [256, 128], strides = [1, 1]} : vector<256x512xbf16> to vector<256x128xbf16>
    %c2 = arith.constant 2 : index
    %c0_10 = arith.constant 0 : index
    %c0_11 = arith.constant 0 : index
    %16 = vector.load %arg4[%c2, %c0_10, %c0_11] : memref<4x256x128xbf16, #tpu.memory_space<vmem>>, vector<1x256x128xbf16>
    %17 = vector.shape_cast %16 : vector<1x256x128xbf16> to vector<256x128xbf16>
    %18 = vector.shape_cast %15 : vector<256x128xbf16> to vector<1x256x128xbf16>
    tpu.vector_store %arg4[%c2, %c0_10, %c0_11], %18 {strides = array<i32>} : memref<4x256x128xbf16, #tpu.memory_space<vmem>>, vector<1x256x128xbf16>,
    %19 = vector.extract_strided_slice %6 {offsets = [0, 384], sizes = [256, 128], strides = [1, 1]} : vector<256x512xbf16> to vector<256x128xbf16>
    %c3 = arith.constant 3 : index
    %c0_12 = arith.constant 0 : index
    %c0_13 = arith.constant 0 : index
    %20 = vector.load %arg4[%c3, %c0_12, %c0_13] : memref<4x256x128xbf16, #tpu.memory_space<vmem>>, vector<1x256x128xbf16>
    %21 = vector.shape_cast %20 : vector<1x256x128xbf16> to vector<256x128xbf16>
    %22 = vector.shape_cast %19 : vector<256x128xbf16> to vector<1x256x128xbf16>
    tpu.vector_store %arg4[%c3, %c0_12, %c0_13], %22 {strides = array<i32>} : memref<4x256x128xbf16, #tpu.memory_space<vmem>>, vector<1x256x128xbf16>,
    %c0_14 = arith.constant 0 : index
    %c0_15 = arith.constant 0 : index
    %23 = vector.load %arg3[%c0_14, %c0_15] : memref<512x8xbf16, #tpu.memory_space<vmem>>, vector<512x8xbf16>
    %cst_16 = arith.constant dense<0.000000e+00> : vector<256x8xf32>
    %24 = tpu.matmul %6, %23, %cst_16 {dimension_numbers = #tpu.dot_dimension_numbers<[1], [0], [0], [1], [0, 0, 1, 1], [], []>} : vector<256x512xbf16>, vector<512x8xbf16>, vector<256x8xf32> -> vector<256x8xf32>
    %c0_17 = arith.constant 0 : index
    %c0_18 = arith.constant 0 : index
    %25 = vector.load %arg6[%c0_17, %c0_18] : memref<256x8xf32, #tpu.memory_space<vmem>>, vector<256x8xf32>
    tpu.vector_store %arg6[%c0_17, %c0_18], %24 {strides = array<i32>} : memref<256x8xf32, #tpu.memory_space<vmem>>, vector<256x8xf32>,
    return
  }
  func.func @transform_0(%arg0: i32) -> (i32, i32) {
    %c0_i32 = arith.constant 0 : i32
    %c0_i32_0 = arith.constant 0 : i32
    return %arg0, %c0_i32 : i32, i32
  }
  func.func @transform_1(%arg0: i32) -> (i32, i32) {
    %c0_i32 = arith.constant 0 : i32
    %c0_i32_0 = arith.constant 0 : i32
    %c0_i32_1 = arith.constant 0 : i32
    return %c0_i32, %c0_i32_0 : i32, i32
  }
  func.func @transform_2(%arg0: i32) -> (i32, i32) {
    %c0_i32 = arith.constant 0 : i32
    %c0_i32_0 = arith.constant 0 : i32
    %c0_i32_1 = arith.constant 0 : i32
    return %c0_i32, %c0_i32_0 : i32, i32
  }
  func.func @transform_3(%arg0: i32) -> (i32, i32, i32) {
    %c0_i32 = arith.constant 0 : i32
    %c0_i32_0 = arith.constant 0 : i32
    %c0_i32_1 = arith.constant 0 : i32
    return %c0_i32, %arg0, %c0_i32_0 : i32, i32, i32
  }
  func.func @transform_4(%arg0: i32) -> (i32, i32) {
    %c0_i32 = arith.constant 0 : i32
    %c0_i32_0 = arith.constant 0 : i32
    return %arg0, %c0_i32 : i32, i32
  }
  func.func @transform_5(%arg0: i32) -> (i32, i32) {
    %c0_i32 = arith.constant 0 : i32
    %c0_i32_0 = arith.constant 0 : i32
    return %arg0, %c0_i32 : i32, i32
  }
}

</mosaic_0001>

<bundles_post_ra>
// kernel: tpu_custom_call.1
= control target key start
LH: loop header
LB: loop body
LE: loop exit
PB: predicated region body
PF: predicated region fallthrough
CT: control target
= control target key end

     0   :  { %11 = vsyncpa [#allocation3], 0  ;;  %s5465_s0 = inlined_call_operand.vmem [shape: bf16[512,128], index: 0, kind: input, shape index: {}]   ;;  %s5466_s1 = inlined_call_operand.hbm [shape: bf16[128,1024], index: 1, kind: input, shape index: {}]   ;;  %s5467_s2 = inlined_call_operand.vmem [shape: bf16[512,8], index: 2, kind: input, shape index: {}]   ;;  %s5468_s3 = inlined_call_operand.hbm [shape: bf16[4,512,128], index: 3, kind: output, shape index: {0}]   ;;  %s5469_s4 = inlined_call_operand.hbm [shape: f32[512,512], index: 4, kind: output, shape index: {1}]   ;;  %s5470_s5 = inlined_call_operand.vmem [shape: f32[512,8], index: 5, kind: output, shape index: {2}]  }
   0x1   :  { %12 = vsyncpa [#allocation4], 0 }
   0x2   :  { %14 = vsyncpa [#allocation4 + $0x1], 0 }
   0x3   :  { %15 = vsyncpa [#allocation7], 0 }
   0x4   :  { %17 = vsyncpa [#allocation7 + $0x1], 0  ;;  %s4498_s18 = smov 0   ;;  %s4500_s19 = smov 0  }
   0x5   :  { %s4502_s20 = smov 0   ;;  %s4504_s21 = smov 0  }
   0x6 LB: > { %s4519_s22 = sadd.s32 4294967295, %s4452_s21   ;;  %s3138_s23 = sadd.s32 4294967294, %s4452_s21   ;;  %s4452_s21 = sphi %s4504_s21, %s5487_s21   ;;  %s4448_s20 = sphi %s4502_s20, %s5486_s20   ;;  %s4444_s19 = sphi %s4500_s19, %s5485_s19   ;;  %s4440_s18 = sphi %s4498_s18, %s5484_s18  }
   0x7   : > { %s4523_s24 = sadd.s32 1, %s4452_s21   ;;  %s98_s25 = sadd.s32 1, %s4448_s20 }
   0x8   : > { %s95_s26 = ssub.s32 %s4452_s21, %s4523_s24  ;;  %p108_p0 = scmp.ne.s32.totalorder %s4448_s20, %s4444_s19 }
   0x9   : > { %p96_p1 = scmp.eq.s32.totalorder %s95_s26, 0  ;;  %p109_p2 = scmp.eq.s32.totalorder %s4519_s22, 1 }
   0xa   : > { %p114_p3 = scmp.ne.s32.totalorder %s4444_s19, %s4440_s18  ;;  %p115_p4 = scmp.eq.s32.totalorder %s3138_s23, 1 }
   0xb   : > { %s4534_s27 = scalar_select %p96_p1, %s4448_s20, %s98_s25  }
   0xc   : > { %p4536_p5 = por %p109_p2, %p108_p0  ;;  %p4540_p6 = por %p115_p4, %p114_p3 }
   0xd   : > { %p3139_p7 = scmp.ge.s32.totalorder %s4452_s21, 1  ;;  %p174_p8 = scmp.lt.s32.totalorder %s4452_s21, 3 }
   0xe   : > { %s5474_s28 = scalar_select %p4536_p5, 1, 0 }
   0xf   : > { %s5475_s29 = scalar_select %p4540_p6, 1, 0 }
  0x10   : > { %p5471_p9 = scmp.eq.s32.totalorder %s4519_s22, 0  ;;  %p4547_p10 = pnand %p3139_p7, %p174_p8 }
  0x11   : > { %s4454_s6 = smov [#allocation2]   ;;  %s4354_s11 = scalar_lea.hbm %s5466_s1, 8192 }
  0x12   : > { %s5476_s30 = scalar_select %p4547_p10, 1, 0 }
  0x13   : > { %s186_s7 = sshll.u32 %s4454_s6, 4  ;;  %p4247_p11 = pneg %p4547_p10  ;;  %s187_s7 = int_to_ptr.vmem [resolvable:$true] %s186_s7 }
  0x14   : > { %p4355_p13 = scmp.ne.s32.totalorder %s5466_s1, %s4354_s11  ;;  %p4361_p3 = scmp.lt.u32.totalorder %s4354_s11, %s5466_s1 }
  0x15   : > { %p4555_p12 = pnand %p5471_p9, %p4247_p11 }
  0x17   : > { %p4356_p0 = pneg %p4555_p12 }
  0x19   : > { %p4357_p1 = pnand %p4356_p0, %p4355_p13 }
  0x1b   : > { %p4358_p2 = pneg %p4357_p1 }
  0x1d   : > { %p4363_p4 = pnand %p4361_p3, %p4358_p2 }
  0x1f   : > { %4366 = shalt.err (!%p4363_p4)
}
  0x20   : > { %s4367_s16 = scalar_lea.vmem %s187_s7, 8192  ;;  %p4375_p9 = scmp.lt.s32.totalorder %s187_s7, %s187_s7 }
  0x21   : > { %p4368_p7 = scmp.ne.s32.totalorder %s187_s7, %s4367_s16  ;;  %p4376_p6 = scmp.lt.s32.totalorder %s4367_s16, %s4367_s16 }
  0x23   : > { %p4370_p8 = pnand %p4368_p7, %p4356_p0  ;;  %p4377_p5 = por %p4376_p6, %p4375_p9 }
  0x25   : > { %p4371_p11 = pneg %p4370_p8 }
  0x27   : > { %p4378_p10 = pnand %p4377_p5, %p4371_p11 }
  0x29   : > { %4381 = shalt.err (!%p4378_p10)
}
  0x2a   : > { %s4455_s17 = smov 512   ;;  %s4456_s23 = smov 32  }
  0x2b   : > { %4250 = dma.hbm_to_vmem [thread:$0]  (!%p4555_p12), %s5466_s1, 8192, %s187_s7, [#allocation3], %s4455_s17, %s4455_s17, %s4456_s23  }
  0x2c   : > { %p5478_p13 = scmp.ne.s32.totalorder %s5476_s30, 0 }
  0x2d   : > { %p5479_p1 = scmp.eq.s32.totalorder (!%p5478_p13), %s4519_s22, 0 }
  0x2e   : > { %214 = sbr.rel (%p5478_p13) target bundleno = 720 (0x2d0), region = 32 }
  0x35   : > { %4427 = dma.done.wait (%p5479_p1), [#allocation3], 8192   ;;  %p5480_p0 = pmov %p5479_p1 }
  0x36   : > { %v4457_v0 = vmov 0   ;;  %s3146_s6 = sshll.u32 %s4519_s22, 5  ;;  %v299_v1 = vld [vmem:[#allocation2] sm:$0xff]  ;;  %v300_v3 = vld [vmem:[#allocation2 + $0x8] sm:$0xff]  ;;  %v301_v62 = vld [vmem:[#allocation2 + $0x10] sm:$0xff]  ;;  %s4847_s15 = sand.u32 1, %s4444_s19  }
  0x37   : > { %4429 = vsyncadd (%p5480_p0), [#allocation3], 4294959104  ;;  %811 = vmatprep.mubr.bf16.mxu0 %v4457_v0  ;;  %1004 = vmatprep.mubr.bf16.mxu1 %v4457_v0  ;;  %p4584_p5 = scmp.lt.s32.totalorder %s3146_s6, 63  ;;  %v303_v2 = vld [vmem:[#allocation2 + $0x20] sm:$0xff]  ;;  %v304_v5 = vld [vmem:[#allocation2 + $0x28] sm:$0xff]  ;;  %s3144_s16 = sshll.u32 %s4847_s15, 9 }
  0x38   : > { %v3167_v4 = vcombine.high %v299_v1, %v303_v2  ;;  %v3166_v6 = vcombine.low %v299_v1, %v303_v2  ;;  %v307_v7 = vld [vmem:[#allocation2 + $0x40] sm:$0xff]  ;;  %v3169_v9 = vcombine.high %v300_v3, %v304_v5  ;;  %v3168_v10 = vcombine.low %v300_v3, %v304_v5  ;;  %v308_v12 = vld [vmem:[#allocation2 + $0x48] sm:$0xff]  ;;  %v305_v63 = vld [vmem:[#allocation2 + $0x30] sm:$0xff]  ;;  %s4860_s17 = scalar_lea.vmem [#allocation5], %s3144_s16  ;;  %s3145_s23 = sshll.u32 %s4847_s15, 10 }
  0x39   : > { %v311_v8 = vld [vmem:[#allocation2 + $0x60] sm:$0xff]  ;;  %v312_v13 = vld [vmem:[#allocation2 + $0x68] sm:$0xff]  ;;  %s5489_s6 = smov (!%p4584_p5, %s3146_s6), 63  ;;  %v302_v2 = vld [vmem:[#allocation2 + $0x18] sm:$0xff]  ;;  %s5177_s25 = scalar_lea.vmem [#allocation6], %s3145_s23  ;;  %vm2900_vm0 = vcmask 64512  }
  0x3a   : > { %v3175_v11 = vcombine.high %v307_v7, %v311_v8  ;;  %v315_v14 = vld [vmem:[#allocation2 + $0x80] sm:$0xff]  ;;  %779 = vmatprep.subr.bf16.mxu0 %v3167_v4  ;;  %v3177_v15 = vcombine.high %v308_v12, %v312_v13  ;;  %v316_v17 = vld [vmem:[#allocation2 + $0x88] sm:$0xff]  ;;  %972 = vmatprep.subr.bf16.mxu1 %v3169_v9  ;;  %v3174_v19 = vcombine.low %v307_v7, %v311_v8  ;;  %s3147_s30 = sshll.u32 %s5489_s6, 2  ;;  %v306_v3 = vld [vmem:[#allocation2 + $0x38] sm:$0xff]  ;;  %s3149_s26 = sshll.u32 %s5489_s6, 3 }
  0x3b   : > { %v319_v16 = vld [vmem:[#allocation2 + $0xa0] sm:$0xff]  ;;  %v320_v18 = vld [vmem:[#allocation2 + $0xa8] sm:$0xff]  ;;  %780 = vmatpush1.bf16.msra.mxu0 %v3166_v6  ;;  %973 = vmatpush1.bf16.msra.mxu1 %v3168_v10  ;;  %v3176_v20 = vcombine.low %v308_v12, %v312_v13  ;;  %s4596_s10 = scalar_lea.vmem %s5465_s0, %s3147_s30  ;;  %v3171_v6 = vcombine.high %v301_v62, %v305_v63  ;;  %v3173_v8 = vcombine.high %v302_v2, %v306_v3  ;;  %v309_v9 = vld [vmem:[#allocation2 + $0x50] sm:$0xff]  ;;  %s5329_s7 = scalar_lea.vmem %s5470_s5, %s3149_s26 }
  0x3c   : > { %781 = vmatprep.subr.bf16.mxu0 %v3175_v11  ;;  %v3183_v21 = vcombine.high %v315_v14, %v319_v16  ;;  %974 = vmatprep.subr.bf16.mxu1 %v3177_v15  ;;  %v3185_v22 = vcombine.high %v316_v17, %v320_v18  ;;  %v323_v23 = vld [vmem:[#allocation2 + $0xc0] sm:$0xff]  ;;  %v324_v25 = vld [vmem:[#allocation2 + $0xc8] sm:$0xff]  ;;  %v3182_v27 = vcombine.low %v315_v14, %v319_v16  ;;  %v313_v10 = vld [vmem:[#allocation2 + $0x70] sm:$0xff]  ;;  %s2934_s6 = scalar_lea.sflag [#allocation4], %s4847_s15  ;;  %s2939_s9 = scalar_lea.sflag [#allocation7], %s4847_s15 }
  0x3d   : > { %v327_v24 = vld [vmem:[#allocation2 + $0xe0] sm:$0xff]  ;;  %v328_v26 = vld [vmem:[#allocation2 + $0xe8] sm:$0xff]  ;;  %v3184_v28 = vcombine.low %v316_v17, %v320_v18  ;;  %v3170_v11 = vcombine.low %v301_v62, %v305_v63  ;;  %v310_v12 = vld [vmem:[#allocation2 + $0x58] sm:$0xff]  ;;  %v3172_v14 = vcombine.low %v302_v2, %v306_v3  ;;  %v3179_v16 = vcombine.high %v309_v9, %v313_v10 }
  0x3e   : > { %v3191_v29 = vcombine.high %v323_v23, %v327_v24  ;;  %v3193_v30 = vcombine.high %v324_v25, %v328_v26  ;;  %v331_v31 = vld [vmem:[#allocation2 + $0x100] sm:$0xff]  ;;  %v332_v33 = vld [vmem:[#allocation2 + $0x108] sm:$0xff]  ;;  %v3190_v35 = vcombine.low %v323_v23, %v327_v24  ;;  %v3192_v36 = vcombine.low %v324_v25, %v328_v26  ;;  %v314_v13 = vld [vmem:[#allocation2 + $0x78] sm:$0xff] }
  0x3f   : > { %782 = vmatpush1.bf16.msra.mxu0 %v3174_v19  ;;  %975 = vmatpush1.bf16.msra.mxu1 %v3176_v20  ;;  %v335_v32 = vld [vmem:[#allocation2 + $0x120] sm:$0xff]  ;;  %v336_v34 = vld [vmem:[#allocation2 + $0x128] sm:$0xff]  ;;  %v317_v15 = vld [vmem:[#allocation2 + $0x90] sm:$0xff]  ;;  %v3181_v18 = vcombine.high %v310_v12, %v314_v13  ;;  %v3180_v23 = vcombine.low %v310_v12, %v314_v13 }
  0x40   : > { %783 = vmatprep.subr.bf16.mxu0 %v3183_v21  ;;  %976 = vmatprep.subr.bf16.mxu1 %v3185_v22  ;;  %v3199_v37 = vcombine.high %v331_v31, %v335_v32  ;;  %v339_v38 = vld [vmem:[#allocation2 + $0x140] sm:$0xff]  ;;  %v3201_v39 = vcombine.high %v332_v33, %v336_v34  ;;  %v340_v41 = vld [vmem:[#allocation2 + $0x148] sm:$0xff]  ;;  %v3198_v43 = vcombine.low %v331_v31, %v335_v32  ;;  %v321_v17 = vld [vmem:[#allocation2 + $0xb0] sm:$0xff] }
  0x41   : > { %v343_v40 = vld [vmem:[#allocation2 + $0x160] sm:$0xff]  ;;  %v344_v42 = vld [vmem:[#allocation2 + $0x168] sm:$0xff]  ;;  %v3200_v44 = vcombine.low %v332_v33, %v336_v34  ;;  %v318_v19 = vld [vmem:[#allocation2 + $0x98] sm:$0xff]  ;;  %v3178_v21 = vcombine.low %v309_v9, %v313_v10  ;;  %v3187_v24 = vcombine.high %v317_v15, %v321_v17 }
  0x42   : > { %v3207_v45 = vcombine.high %v339_v38, %v343_v40  ;;  %v3209_v46 = vcombine.high %v340_v41, %v344_v42  ;;  %v347_v47 = vld [vmem:[#allocation2 + $0x180] sm:$0xff]  ;;  %v348_v49 = vld [vmem:[#allocation2 + $0x188] sm:$0xff]  ;;  %v3206_v51 = vcombine.low %v339_v38, %v343_v40  ;;  %v3208_v52 = vcombine.low %v340_v41, %v344_v42  ;;  %v322_v20 = vld [vmem:[#allocation2 + $0xb8] sm:$0xff] }
  0x43   : > { %784 = vmatpush1.bf16.msra.mxu0 %v3182_v27  ;;  %977 = vmatpush1.bf16.msra.mxu1 %v3184_v28  ;;  %v351_v48 = vld [vmem:[#allocation2 + $0x1a0] sm:$0xff]  ;;  %v352_v50 = vld [vmem:[#allocation2 + $0x1a8] sm:$0xff]  ;;  %v325_v25 = vld [vmem:[#allocation2 + $0xd0] sm:$0xff]  ;;  %v3189_v26 = vcombine.high %v318_v19, %v322_v20  ;;  %v3188_v33 = vcombine.low %v318_v19, %v322_v20 }
  0x44   : > { %785 = vmatprep.subr.bf16.mxu0 %v3191_v29  ;;  %978 = vmatprep.subr.bf16.mxu1 %v3193_v30  ;;  %v3215_v53 = vcombine.high %v347_v47, %v351_v48  ;;  %v3217_v54 = vcombine.high %v348_v49, %v352_v50  ;;  %v355_v55 = vld [vmem:[#allocation2 + $0x1c0] sm:$0xff]  ;;  %v356_v57 = vld [vmem:[#allocation2 + $0x1c8] sm:$0xff]  ;;  %v3214_v59 = vcombine.low %v347_v47, %v351_v48  ;;  %v329_v27 = vld [vmem:[#allocation2 + $0xf0] sm:$0xff] }
  0x45   : > { %v359_v56 = vld [vmem:[#allocation2 + $0x1e0] sm:$0xff]  ;;  %v360_v58 = vld [vmem:[#allocation2 + $0x1e8] sm:$0xff]  ;;  %v3216_v60 = vcombine.low %v348_v49, %v352_v50  ;;  %v326_v28 = vld [vmem:[#allocation2 + $0xd8] sm:$0xff]  ;;  %v3186_v30 = vcombine.low %v317_v15, %v321_v17  ;;  %v3195_v34 = vcombine.high %v325_v25, %v329_v27 }
  0x46   : > { %v3223_v61 = vcombine.high %v355_v55, %v359_v56  ;;  %v3225_v1 = vcombine.high %v356_v57, %v360_v58  ;;  %v3222_v4 = vcombine.low %v355_v55, %v359_v56  ;;  %v3224_v5 = vcombine.low %v356_v57, %v360_v58  ;;  %v4599_v7 = vld [vmem:[%s4596_s10] sm:$0xff]   ;;  %v4605_v22 = vld [vmem:[%s4596_s10 + $0x8] sm:$0xff]   ;;  %v330_v29 = vld [vmem:[#allocation2 + $0xf8] sm:$0xff] }
  0x47   : > { %786 = vmatpush1.bf16.msra.mxu0 %v3190_v35  ;;  %979 = vmatpush1.bf16.msra.mxu1 %v3192_v36  ;;  %v333_v31 = vld [vmem:[#allocation2 + $0x110] sm:$0xff]  ;;  %v334_v35 = vld [vmem:[#allocation2 + $0x118] sm:$0xff]  ;;  %v3196_v42 = vcombine.low %v326_v28, %v330_v29  ;;  %v4630_v9 = vld [vmem:[%s4596_s10 + $0x20] sm:$0xff]  }
  0x48   : > { %787 = vmatprep.subr.bf16.mxu0 %v3199_v37  ;;  %980 = vmatprep.subr.bf16.mxu1 %v3201_v39  ;;  %v337_v32 = vld [vmem:[#allocation2 + $0x130] sm:$0xff]  ;;  %v338_v36 = vld [vmem:[#allocation2 + $0x138] sm:$0xff]  ;;  %v3197_v37 = vcombine.high %v326_v28, %v330_v29  ;;  %v3194_v39 = vcombine.low %v325_v25, %v329_v27  ;;  %v4323_v10 = vld [vmem:[%s5467_s2 + $0xc0] sm:$0xff]  }
  0x49   : > { %v4613_v38 = vld [vmem:[%s4596_s10 + $0x10] sm:$0xff]   ;;  %v3202_v47 = vcombine.low %v333_v31, %v337_v32  ;;  %v3204_v50 = vcombine.low %v334_v35, %v338_v36  ;;  %v4620_v55 = vld [vmem:[%s4596_s10 + $0x18] sm:$0xff]   ;;  %v4668_v15 = vld [vmem:[%s4596_s10 + $0x48] sm:$0xff]  }
  0x4a   : > { %v341_v40 = vld [vmem:[#allocation2 + $0x150] sm:$0xff]  ;;  %v362_v62 = vld [vmem:[#allocation2 + $0x1f8] sm:$0xff]  ;;  %v4696_v19 = vld [vmem:[%s4596_s10 + $0x68] sm:$0xff]  }
  0x4b   : > { %788 = vmatpush1.bf16.msra.mxu0 %v3198_v43  ;;  %981 = vmatpush1.bf16.msra.mxu1 %v3200_v44  ;;  %v345_v41 = vld [vmem:[#allocation2 + $0x170] sm:$0xff]  ;;  %v3203_v43 = vcombine.high %v333_v31, %v337_v32  ;;  %v342_v44 = vld [vmem:[#allocation2 + $0x158] sm:$0xff]  ;;  %v4326_v25 = vld [vmem:[%s5467_s2 + $0x48] sm:$0xff]  }
  0x4c   : > { %789 = vmatprep.subr.bf16.mxu0 %v3207_v45  ;;  %982 = vmatprep.subr.bf16.mxu1 %v3209_v46  ;;  %v346_v45 = vld [vmem:[#allocation2 + $0x178] sm:$0xff]  ;;  %v3205_v46 = vcombine.high %v334_v35, %v338_v36  ;;  %v349_v48 = vld [vmem:[#allocation2 + $0x190] sm:$0xff]  ;;  %v3210_v56 = vcombine.low %v341_v40, %v345_v41  ;;  %v4328_v27 = vld [vmem:[%s5467_s2 + $0x8] sm:$0xff]  }
  0x4d   : > { %v353_v49 = vld [vmem:[#allocation2 + $0x1b0] sm:$0xff]  ;;  %v4654_v13 = vld [vmem:[%s4596_s10 + $0x38] sm:$0xff]   ;;  %v4329_v28 = vld [vmem:[%s5467_s2 + $0x88] sm:$0xff]  }
  0x4e   : > { %v357_v57 = vld [vmem:[#allocation2 + $0x1d0] sm:$0xff]  ;;  %v4682_v17 = vld [vmem:[%s4596_s10 + $0x58] sm:$0xff]   ;;  %v4338_v36 = vld [vmem:[%s5467_s2 + $0x60] sm:$0xff]  }
  0x4f   : > { %790 = vmatpush1.bf16.msra.mxu0 %v3206_v51  ;;  %983 = vmatpush1.bf16.msra.mxu1 %v3208_v52  ;;  %v3211_v51 = vcombine.high %v341_v40, %v345_v41  ;;  %v3213_v52 = vcombine.high %v342_v44, %v346_v45  ;;  %v361_v58 = vld [vmem:[#allocation2 + $0x1f0] sm:$0xff]  ;;  %v4334_v32 = vld [vmem:[%s5467_s2 + $0x58] sm:$0xff]   ;;  %v4342_v40 = vld [vmem:[%s5467_s2 + $0x68] sm:$0xff]  }
  0x50   : > { %791 = vmatprep.subr.bf16.mxu0 %v3215_v53  ;;  %984 = vmatprep.subr.bf16.mxu1 %v3217_v54  ;;  %v350_v53 = vld [vmem:[#allocation2 + $0x198] sm:$0xff]  ;;  %v3227_v3 = vcombine.high %v357_v57, %v361_v58  ;;  %v4647_v12 = vld [vmem:[%s4596_s10 + $0x30] sm:$0xff]   ;;  %v4343_v41 = vld [vmem:[%s5467_s2 + $0xe8] sm:$0xff]  }
  0x51   : > { %v354_v54 = vld [vmem:[#allocation2 + $0x1b8] sm:$0xff]  ;;  %v4703_v20 = vld [vmem:[%s4596_s10 + $0x70] sm:$0xff]  }
  0x52   : > { %v3221_v63 = vcombine.high %v350_v53, %v354_v54  ;;  %v3220_v2 = vcombine.low %v350_v53, %v354_v54  ;;  %v4330_v29 = vld [vmem:[%s5467_s2 + $0x50] sm:$0xff]   ;;  %v4337_v35 = vld [vmem:[%s5467_s2 + $0x98] sm:$0xff]  }
  0x53   : > { %792 = vmatpush1.bf16.msra.mxu0 %v3214_v59  ;;  %985 = vmatpush1.bf16.msra.mxu1 %v3216_v60  ;;  %v3212_v59 = vcombine.low %v342_v44, %v346_v45  ;;  %v3219_v60 = vcombine.high %v349_v48, %v353_v49  ;;  %v4333_v31 = vld [vmem:[%s5467_s2 + $0x90] sm:$0xff]  }
  0x54   : > { %793 = vmatprep.subr.bf16.mxu0 %v3223_v61  ;;  %986 = vmatprep.subr.bf16.mxu1 %v3225_v1  ;;  %v358_v61 = vld [vmem:[#allocation2 + $0x1d8] sm:$0xff]  ;;  %v3218_v1 = vcombine.low %v349_v48, %v353_v49  ;;  %v4346_v44 = vld [vmem:[%s5467_s2 + $0x70] sm:$0xff]  }
  0x55   : > { %v4348_v45 = vld [vmem:[%s5467_s2 + $0x30] sm:$0xff]   ;;  %v4351_v48 = vld [vmem:[%s5467_s2 + $0xf8] sm:$0xff]  }
  0x56   : > { %v4352_v49 = vld [vmem:[%s5467_s2 + $0x38] sm:$0xff]  }
  0x57   : > { %794 = vmatpush1.bf16.msra.mxu0 %v3222_v4  ;;  %987 = vmatpush1.bf16.msra.mxu1 %v3224_v5  ;;  %v3229_v4 = vcombine.high %v358_v61, %v362_v62  ;;  %v3226_v5 = vcombine.low %v357_v57, %v361_v58 }
  0x58   : > { %1165 = vmatprep.subr.bf16.mxu0 %v3171_v6  ;;  %1358 = vmatprep.subr.bf16.mxu1 %v3173_v8  ;;  %v3228_v6 = vcombine.low %v358_v61, %v362_v62  ;;  %v4322_v8 = vld [vmem:[%s5467_s2 + $0x40] sm:$0xff]  }
  0x5a   : > { %812 = vmatmul.mubr.bf16.vlgmr.msra.gmra.mrb[0].mxu0 %v4599_v7  ;;  %1005 = vmatmul.mubr.bf16.vlgmr.msra.gmra.mrb[0].mxu1 %v4599_v7 }
  0x5b   : > { %1166 = vmatpush1.bf16.msra.mxu0 %v3170_v11  ;;  %1359 = vmatpush1.bf16.msra.mxu1 %v3172_v14  ;;  %v4640_v11 = vld [vmem:[%s4596_s10 + $0x28] sm:$0xff]   ;;  %v4661_v14 = vld [vmem:[%s4596_s10 + $0x40] sm:$0xff]  }
  0x5c   : > { %821 = vmatprep.mubr.bf16.mxu0 %v4457_v0  ;;  %1014 = vmatprep.mubr.bf16.mxu1 %v4457_v0 }
  0x5d   : > { %1167 = vmatprep.subr.bf16.mxu0 %v3179_v16  ;;  %1360 = vmatprep.subr.bf16.mxu1 %v3181_v18  ;;  %v4675_v16 = vld [vmem:[%s4596_s10 + $0x50] sm:$0xff]   ;;  %v4689_v18 = vld [vmem:[%s4596_s10 + $0x60] sm:$0xff]  }
  0x5f   : > { %1168 = vmatpush1.bf16.msra.mxu0 %v3178_v21  ;;  %1361 = vmatpush1.bf16.msra.mxu1 %v3180_v23  ;;  %v4710_v21 = vld [vmem:[%s4596_s10 + $0x78] sm:$0xff]   ;;  %v4324_v23 = vld [vmem:[%s5467_s2] sm:$0xff]  }
  0x60   : > { %1169 = vmatprep.subr.bf16.mxu0 %v3187_v24  ;;  %1362 = vmatprep.subr.bf16.mxu1 %v3189_v26  ;;  %v4325_v24 = vld [vmem:[%s5467_s2 + $0x80] sm:$0xff]   ;;  %v4327_v26 = vld [vmem:[%s5467_s2 + $0xc8] sm:$0xff]  }
  0x62   : > { %822 = vmatmul.mubr.bf16.gmra.mrb[4].mxu0 %v4605_v22  ;;  %1015 = vmatmul.mubr.bf16.gmra.mrb[4].mxu1 %v4605_v22 }
  0x63   : > { %831 = vmatprep.mubr.bf16.mxu0 %v4457_v0  ;;  %1024 = vmatprep.mubr.bf16.mxu1 %v4457_v0 }
  0x64   : > { %1170 = vmatpush1.bf16.msra.mxu0 %v3186_v30  ;;  %1363 = vmatpush1.bf16.msra.mxu1 %v3188_v33  ;;  %v4332_v30 = vld [vmem:[%s5467_s2 + $0x10] sm:$0xff]   ;;  %v4335_v33 = vld [vmem:[%s5467_s2 + $0xd8] sm:$0xff]  }
  0x65   : > { %1171 = vmatprep.subr.bf16.mxu0 %v3195_v34  ;;  %1364 = vmatprep.subr.bf16.mxu1 %v3197_v37  ;;  %v4336_v34 = vld [vmem:[%s5467_s2 + $0x18] sm:$0xff]   ;;  %v4340_v37 = vld [vmem:[%s5467_s2 + $0x20] sm:$0xff]  }
  0x68   : > { %1172 = vmatpush1.bf16.msra.mxu0 %v3194_v39  ;;  %1365 = vmatpush1.bf16.msra.mxu1 %v3196_v42  ;;  %v4341_v39 = vld [vmem:[%s5467_s2 + $0xa0] sm:$0xff]   ;;  %v4344_v42 = vld [vmem:[%s5467_s2 + $0x28] sm:$0xff]  }
  0x69   : > { %1173 = vmatprep.subr.bf16.mxu0 %v3203_v43  ;;  %1366 = vmatprep.subr.bf16.mxu1 %v3205_v46  ;;  %v4345_v43 = vld [vmem:[%s5467_s2 + $0xa8] sm:$0xff]   ;;  %v4349_v46 = vld [vmem:[%s5467_s2 + $0xb0] sm:$0xff]  }
  0x6a   : > { %832 = vmatmul.mubr.bf16.gmra.mrb[8].mxu0 %v4613_v38  ;;  %1025 = vmatmul.mubr.bf16.gmra.mrb[8].mxu1 %v4613_v38 }
  0x6b   : > { %841 = vmatprep.mubr.bf16.mxu0 %v4457_v0  ;;  %1034 = vmatprep.mubr.bf16.mxu1 %v4457_v0 }
  0x6c   : > { %1174 = vmatpush1.bf16.msra.mxu0 %v3202_v47  ;;  %1367 = vmatpush1.bf16.msra.mxu1 %v3204_v50  ;;  %v4350_v47 = vld [vmem:[%s5467_s2 + $0x78] sm:$0xff]  }
  0x6d   : > { %1175 = vmatprep.subr.bf16.mxu0 %v3211_v51  ;;  %1368 = vmatprep.subr.bf16.mxu1 %v3213_v52  ;;  %v4353_v50 = vld [vmem:[%s5467_s2 + $0xb8] sm:$0xff]  }
  0x70   : > { %1176 = vmatpush1.bf16.msra.mxu0 %v3210_v56  ;;  %1369 = vmatpush1.bf16.msra.mxu1 %v3212_v59 }
  0x71   : > { %1177 = vmatprep.subr.bf16.mxu0 %v3219_v60  ;;  %1370 = vmatprep.subr.bf16.mxu1 %v3221_v63 }
  0x72   : > { %842 = vmatmul.mubr.bf16.gmra.mrb[12].mxu0 %v4620_v55  ;;  %1035 = vmatmul.mubr.bf16.gmra.mrb[12].mxu1 %v4620_v55 }
  0x73   : > { %851 = vmatprep.mubr.bf16.mxu0 %v4457_v0  ;;  %1044 = vmatprep.mubr.bf16.mxu1 %v4457_v0 }
  0x74   : > { %1178 = vmatpush1.bf16.msra.mxu0 %v3218_v1  ;;  %1371 = vmatpush1.bf16.msra.mxu1 %v3220_v2 }
  0x75   : > { %1179 = vmatprep.subr.bf16.mxu0 %v3227_v3  ;;  %1372 = vmatprep.subr.bf16.mxu1 %v3229_v4 }
  0x78   : > { %1180 = vmatpush1.bf16.msra.mxu0 %v3226_v5  ;;  %1373 = vmatpush1.bf16.msra.mxu1 %v3228_v6 }
  0x79   : > { %4009 = vmatprep.subr.bf16.mxu0 %v4322_v8  ;;  %4121 = vmatprep.subr.bf16.mxu1 %v4323_v10 }
  0x7a   : > { %852 = vmatmul.mubr.bf16.gmra.mrb[16].mxu0 %v4630_v9  ;;  %1045 = vmatmul.mubr.bf16.gmra.mrb[16].mxu1 %v4630_v9 }
  0x7b   : > { %861 = vmatprep.mubr.bf16.mxu0 %v4457_v0  ;;  %1054 = vmatprep.mubr.bf16.mxu1 %v4457_v0 }
  0x82   : > { %862 = vmatmul.mubr.bf16.gmra.mrb[20].mxu0 %v4640_v11  ;;  %1055 = vmatmul.mubr.bf16.gmra.mrb[20].mxu1 %v4640_v11 }
  0x83   : > { %871 = vmatprep.mubr.bf16.mxu0 %v4457_v0  ;;  %1064 = vmatprep.mubr.bf16.mxu1 %v4457_v0 }
  0x8a   : > { %872 = vmatmul.mubr.bf16.gmra.mrb[24].mxu0 %v4647_v12  ;;  %1065 = vmatmul.mubr.bf16.gmra.mrb[24].mxu1 %v4647_v12 }
  0x8b   : > { %881 = vmatprep.mubr.bf16.mxu0 %v4457_v0  ;;  %1074 = vmatprep.mubr.bf16.mxu1 %v4457_v0 }
  0x92   : > { %882 = vmatmul.mubr.bf16.gmra.mrb[28].mxu0 %v4654_v13  ;;  %1075 = vmatmul.mubr.bf16.gmra.mrb[28].mxu1 %v4654_v13 }
  0x93   : > { %891 = vmatprep.mubr.bf16.mxu0 %v4457_v0  ;;  %1084 = vmatprep.mubr.bf16.mxu1 %v4457_v0 }
  0x9a   : > { %892 = vmatmul.mubr.bf16.gmra.mrb[32].mxu0 %v4661_v14  ;;  %1085 = vmatmul.mubr.bf16.gmra.mrb[32].mxu1 %v4661_v14 }
  0x9b   : > { %901 = vmatprep.mubr.bf16.mxu0 %v4457_v0  ;;  %1094 = vmatprep.mubr.bf16.mxu1 %v4457_v0 }
  0xa2   : > { %902 = vmatmul.mubr.bf16.gmra.mrb[36].mxu0 %v4668_v15  ;;  %1095 = vmatmul.mubr.bf16.gmra.mrb[36].mxu1 %v4668_v15 }
  0xa3   : > { %911 = vmatprep.mubr.bf16.mxu0 %v4457_v0  ;;  %1104 = vmatprep.mubr.bf16.mxu1 %v4457_v0 }
  0xaa   : > { %912 = vmatmul.mubr.bf16.gmra.mrb[40].mxu0 %v4675_v16  ;;  %1105 = vmatmul.mubr.bf16.gmra.mrb[40].mxu1 %v4675_v16 }
  0xab   : > { %921 = vmatprep.mubr.bf16.mxu0 %v4457_v0  ;;  %1114 = vmatprep.mubr.bf16.mxu1 %v4457_v0 }
  0xb2   : > { %922 = vmatmul.mubr.bf16.gmra.mrb[44].mxu0 %v4682_v17  ;;  %1115 = vmatmul.mubr.bf16.gmra.mrb[44].mxu1 %v4682_v17 }
  0xb3   : > { %931 = vmatprep.mubr.bf16.mxu0 %v4457_v0  ;;  %1124 = vmatprep.mubr.bf16.mxu1 %v4457_v0 }
  0xba   : > { %932 = vmatmul.mubr.bf16.gmra.mrb[48].mxu0 %v4689_v18  ;;  %1125 = vmatmul.mubr.bf16.gmra.mrb[48].mxu1 %v4689_v18 }
  0xbb   : > { %941 = vmatprep.mubr.bf16.mxu0 %v4457_v0  ;;  %1134 = vmatprep.mubr.bf16.mxu1 %v4457_v0 }
  0xc2   : > { %942 = vmatmul.mubr.bf16.gmra.mrb[52].mxu0 %v4696_v19  ;;  %1135 = vmatmul.mubr.bf16.gmra.mrb[52].mxu1 %v4696_v19 }
  0xc3   : > { %951 = vmatprep.mubr.bf16.mxu0 %v4457_v0  ;;  %1144 = vmatprep.mubr.bf16.mxu1 %v4457_v0 }
  0xca   : > { %952 = vmatmul.mubr.bf16.gmra.mrb[56].mxu0 %v4703_v20  ;;  %1145 = vmatmul.mubr.bf16.gmra.mrb[56].mxu1 %v4703_v20 }
  0xcb   : > { %961 = vmatprep.mubr.bf16.mxu0 %v4457_v0  ;;  %1154 = vmatprep.mubr.bf16.mxu1 %v4457_v0 }
  0xd2   : > { %962 = vmatmul.mubr.bf16.gmra.mrb[60].mxu0 %v4710_v21  ;;  %1155 = vmatmul.mubr.bf16.gmra.mrb[60].mxu1 %v4710_v21 }
  0xd3   : > { %1197 = vmatprep.mubr.bf16.mxu0 %v4457_v0  ;;  %1390 = vmatprep.mubr.bf16.mxu1 %v4457_v0 }
  0xda   : > { %1198 = vmatmul.mubr.bf16.vlgmr.msra.gmra.mrb[64].mxu0 %v4599_v7  ;;  %1391 = vmatmul.mubr.bf16.vlgmr.msra.gmra.mrb[64].mxu1 %v4599_v7  ;;  %v4331_v7 = vld [vmem:[%s5467_s2 + $0xd0] sm:$0xff]  }
  0xdb   : > { %4010 = vmatpush3.bf16.msra.mxu0 %v4324_v23  ;;  %4122 = vmatpush3.bf16.msra.mxu1 %v4325_v24 }
  0xdc   : > { %1207 = vmatprep.mubr.bf16.mxu0 %v4457_v0  ;;  %1400 = vmatprep.mubr.bf16.mxu1 %v4457_v0 }
  0xdd   : > { %4011 = vmatprep.subr.bf16.mxu0 %v4326_v25  ;;  %4123 = vmatprep.subr.bf16.mxu1 %v4327_v26 }
  0xdf   : > { %4012 = vmatpush3.bf16.msra.mxu0 %v4328_v27  ;;  %4124 = vmatpush3.bf16.msra.mxu1 %v4329_v28 }
  0xe0   : > { %4013 = vmatprep.subr.bf16.mxu0 %v4330_v29  ;;  %4125 = vmatprep.subr.bf16.mxu1 %v4331_v7 }
  0xe2   : > { %1208 = vmatmul.mubr.bf16.gmra.mrb[68].mxu0 %v4605_v22  ;;  %1401 = vmatmul.mubr.bf16.gmra.mrb[68].mxu1 %v4605_v22  ;;  %v4339_v22 = vld [vmem:[%s5467_s2 + $0xe0] sm:$0xff]  }
  0xe3   : > { %1217 = vmatprep.mubr.bf16.mxu0 %v4457_v0  ;;  %1410 = vmatprep.mubr.bf16.mxu1 %v4457_v0 }
  0xe4   : > { %4014 = vmatpush3.bf16.msra.mxu0 %v4332_v30  ;;  %4126 = vmatpush3.bf16.msra.mxu1 %v4333_v31 }
  0xe5   : > { %4015 = vmatprep.subr.bf16.mxu0 %v4334_v32  ;;  %4127 = vmatprep.subr.bf16.mxu1 %v4335_v33 }
  0xe8   : > { %4016 = vmatpush3.bf16.msra.mxu0 %v4336_v34  ;;  %4128 = vmatpush3.bf16.msra.mxu1 %v4337_v35 }
  0xe9   : > { %4017 = vmatprep.subr.bf16.mxu0 %v4338_v36  ;;  %4129 = vmatprep.subr.bf16.mxu1 %v4339_v22 }
  0xea   : > { %1218 = vmatmul.mubr.bf16.gmra.mrb[72].mxu0 %v4613_v38  ;;  %1411 = vmatmul.mubr.bf16.gmra.mrb[72].mxu1 %v4613_v38  ;;  %v4347_v38 = vld [vmem:[%s5467_s2 + $0xf0] sm:$0xff]  }
  0xeb   : > { %1227 = vmatprep.mubr.bf16.mxu0 %v4457_v0  ;;  %1420 = vmatprep.mubr.bf16.mxu1 %v4457_v0 }
  0xec   : > { %4018 = vmatpush3.bf16.msra.mxu0 %v4340_v37  ;;  %4130 = vmatpush3.bf16.msra.mxu1 %v4341_v39 }
  0xed   : > { %4019 = vmatprep.subr.bf16.mxu0 %v4342_v40  ;;  %4131 = vmatprep.subr.bf16.mxu1 %v4343_v41 }
  0xf0   : > { %4020 = vmatpush3.bf16.msra.mxu0 %v4344_v42  ;;  %4132 = vmatpush3.bf16.msra.mxu1 %v4345_v43 }
  0xf1   : > { %4021 = vmatprep.subr.bf16.mxu0 %v4346_v44  ;;  %4133 = vmatprep.subr.bf16.mxu1 %v4347_v38 }
  0xf2   : > { %1228 = vmatmul.mubr.bf16.gmra.mrb[76].mxu0 %v4620_v55  ;;  %1421 = vmatmul.mubr.bf16.gmra.mrb[76].mxu1 %v4620_v55 }
  0xf3   : > { %1237 = vmatprep.mubr.bf16.mxu0 %v4457_v0  ;;  %1430 = vmatprep.mubr.bf16.mxu1 %v4457_v0 }
  0xf4   : > { %4022 = vmatpush3.bf16.msra.mxu0 %v4348_v45  ;;  %4134 = vmatpush3.bf16.msra.mxu1 %v4349_v46 }
  0xf5   : > { %4023 = vmatprep.subr.bf16.mxu0 %v4350_v47  ;;  %4135 = vmatprep.subr.bf16.mxu1 %v4351_v48 }
  0xf8   : > { %4024 = vmatpush3.bf16.msra.mxu0 %v4352_v49  ;;  %4136 = vmatpush3.bf16.msra.mxu1 %v4353_v50 }
  0xfa   : > { %1238 = vmatmul.mubr.bf16.gmra.mrb[80].mxu0 %v4630_v9  ;;  %1431 = vmatmul.mubr.bf16.gmra.mrb[80].mxu1 %v4630_v9 }
  0xfb   : > { %1247 = vmatprep.mubr.bf16.mxu0 %v4457_v0  ;;  %1440 = vmatprep.mubr.bf16.mxu1 %v4457_v0 }
 0x102   : > { %1248 = vmatmul.mubr.bf16.gmra.mrb[84].mxu0 %v4640_v11  ;;  %1441 = vmatmul.mubr.bf16.gmra.mrb[84].mxu1 %v4640_v11 }
 0x103   : > { %1257 = vmatprep.mubr.bf16.mxu0 %v4457_v0  ;;  %1450 = vmatprep.mubr.bf16.mxu1 %v4457_v0 }
 0x10a   : > { %1258 = vmatmul.mubr.bf16.gmra.mrb[88].mxu0 %v4647_v12  ;;  %1451 = vmatmul.mubr.bf16.gmra.mrb[88].mxu1 %v4647_v12 }
 0x10b   : > { %1267 = vmatprep.mubr.bf16.mxu0 %v4457_v0  ;;  %1460 = vmatprep.mubr.bf16.mxu1 %v4457_v0 }
 0x112   : > { %1268 = vmatmul.mubr.bf16.gmra.mrb[92].mxu0 %v4654_v13  ;;  %1461 = vmatmul.mubr.bf16.gmra.mrb[92].mxu1 %v4654_v13 }
 0x113   : > { %1277 = vmatprep.mubr.bf16.mxu0 %v4457_v0  ;;  %1470 = vmatprep.mubr.bf16.mxu1 %v4457_v0 }
 0x11a   : > { %1278 = vmatmul.mubr.bf16.gmra.mrb[96].mxu0 %v4661_v14  ;;  %1471 = vmatmul.mubr.bf16.gmra.mrb[96].mxu1 %v4661_v14 }
 0x11b   : > { %1287 = vmatprep.mubr.bf16.mxu0 %v4457_v0  ;;  %1480 = vmatprep.mubr.bf16.mxu1 %v4457_v0 }
 0x122   : > { %1288 = vmatmul.mubr.bf16.gmra.mrb[100].mxu0 %v4668_v15  ;;  %1481 = vmatmul.mubr.bf16.gmra.mrb[100].mxu1 %v4668_v15 }
 0x123   : > { %1297 = vmatprep.mubr.bf16.mxu0 %v4457_v0  ;;  %1490 = vmatprep.mubr.bf16.mxu1 %v4457_v0 }
 0x12a   : > { %1298 = vmatmul.mubr.bf16.gmra.mrb[104].mxu0 %v4675_v16  ;;  %1491 = vmatmul.mubr.bf16.gmra.mrb[104].mxu1 %v4675_v16 }
 0x12b   : > { %1307 = vmatprep.mubr.bf16.mxu0 %v4457_v0  ;;  %1500 = vmatprep.mubr.bf16.mxu1 %v4457_v0 }
 0x12d   : > { %v813_v51 = vpop.f32.mrb[0].mxu0  ;;  %v1006_v52 = vpop.f32.mrb[0].mxu1 }
 0x12e   : > { %v815_v53 = vpop.f32.mrb[1].mxu0  ;;  %v1008_v54 = vpop.f32.mrb[1].mxu1 }
 0x12f   : > { %v817_v55 = vpop.f32.mrb[2].mxu0  ;;  %v1010_v57 = vpop.f32.mrb[2].mxu1 }
 0x130   : > { %v4854_v56 = vpack.c.bf16 %v817_v55, %v813_v51  ;;  %v819_v58 = vpop.f32.mrb[3].mxu0  ;;  %v4856_v59 = vpack.c.bf16 %v1010_v57, %v1006_v52  ;;  %v1012_v61 = vpop.f32.mrb[3].mxu1 }
 0x131   : > { %v4858_v60 = vpack.c.bf16 %v819_v58, %v815_v53  ;;  %v4864_v62 = vpack.c.bf16 %v1012_v61, %v1008_v54 }
 0x132   : > { %3630 = vst [vmem:[%s4860_s17] sm:$0xff] %v4854_v56   ;;  %1308 = vmatmul.mubr.bf16.gmra.mrb[108].mxu0 %v4682_v17  ;;  %3977 = vst [vmem:[%s4860_s17 + $0x100] sm:$0xff] %v4856_v59   ;;  %1501 = vmatmul.mubr.bf16.gmra.mrb[108].mxu1 %v4682_v17 }
 0x133   : > { %3961 = vst [vmem:[%s4860_s17 + $0x80] sm:$0xff] %v4858_v60   ;;  %1317 = vmatprep.mubr.bf16.mxu0 %v4457_v0  ;;  %3993 = vst [vmem:[%s4860_s17 + $0x180] sm:$0xff] %v4864_v62   ;;  %1510 = vmatprep.mubr.bf16.mxu1 %v4457_v0 }
 0x135   : > { %v823_v63 = vpop.f32.mrb[4].mxu0  ;;  %v1016_v1 = vpop.f32.mrb[4].mxu1 }
 0x136   : > { %v825_v2 = vpop.f32.mrb[5].mxu0  ;;  %v1018_v3 = vpop.f32.mrb[5].mxu1 }
 0x137   : > { %v827_v4 = vpop.f32.mrb[6].mxu0  ;;  %v1020_v6 = vpop.f32.mrb[6].mxu1 }
 0x138   : > { %v4876_v5 = vpack.c.bf16 %v827_v4, %v823_v63  ;;  %v829_v8 = vpop.f32.mrb[7].mxu0  ;;  %v4878_v9 = vpack.c.bf16 %v1020_v6, %v1016_v1  ;;  %v1022_v11 = vpop.f32.mrb[7].mxu1 }
 0x139   : > { %v4880_v10 = vpack.c.bf16 %v829_v8, %v825_v2  ;;  %v4884_v12 = vpack.c.bf16 %v1022_v11, %v1018_v3 }
 0x13a   : > { %3946 = vst [vmem:[%s4860_s17 + $0x8] sm:$0xff] %v4876_v5   ;;  %1318 = vmatmul.mubr.bf16.gmra.mrb[112].mxu0 %v4689_v18  ;;  %3978 = vst [vmem:[%s4860_s17 + $0x108] sm:$0xff] %v4878_v9   ;;  %1511 = vmatmul.mubr.bf16.gmra.mrb[112].mxu1 %v4689_v18 }
 0x13b   : > { %3962 = vst [vmem:[%s4860_s17 + $0x88] sm:$0xff] %v4880_v10   ;;  %1327 = vmatprep.mubr.bf16.mxu0 %v4457_v0  ;;  %3994 = vst [vmem:[%s4860_s17 + $0x188] sm:$0xff] %v4884_v12   ;;  %1520 = vmatprep.mubr.bf16.mxu1 %v4457_v0 }
 0x13d   : > { %v833_v13 = vpop.f32.mrb[8].mxu0  ;;  %v1026_v14 = vpop.f32.mrb[8].mxu1 }
 0x13e   : > { %v835_v15 = vpop.f32.mrb[9].mxu0  ;;  %v1028_v16 = vpop.f32.mrb[9].mxu1 }
 0x13f   : > { %v837_v17 = vpop.f32.mrb[10].mxu0  ;;  %v1030_v24 = vpop.f32.mrb[10].mxu1 }
 0x140   : > { %v4896_v23 = vpack.c.bf16 %v837_v17, %v833_v13  ;;  %v839_v25 = vpop.f32.mrb[11].mxu0  ;;  %v4898_v26 = vpack.c.bf16 %v1030_v24, %v1026_v14  ;;  %v1032_v27 = vpop.f32.mrb[11].mxu1 }
 0x141   : > { %v4900_v18 = vpack.c.bf16 %v839_v25, %v835_v15  ;;  %v4904_v28 = vpack.c.bf16 %v1032_v27, %v1028_v16 }
 0x142   : > { %3947 = vst [vmem:[%s4860_s17 + $0x10] sm:$0xff] %v4896_v23   ;;  %1328 = vmatmul.mubr.bf16.gmra.mrb[116].mxu0 %v4696_v19  ;;  %3979 = vst [vmem:[%s4860_s17 + $0x110] sm:$0xff] %v4898_v26   ;;  %1521 = vmatmul.mubr.bf16.gmra.mrb[116].mxu1 %v4696_v19 }
 0x143   : > { %3963 = vst [vmem:[%s4860_s17 + $0x90] sm:$0xff] %v4900_v18   ;;  %1337 = vmatprep.mubr.bf16.mxu0 %v4457_v0  ;;  %3995 = vst [vmem:[%s4860_s17 + $0x190] sm:$0xff] %v4904_v28   ;;  %1530 = vmatprep.mubr.bf16.mxu1 %v4457_v0 }
 0x145   : > { %v843_v29 = vpop.f32.mrb[12].mxu0  ;;  %v1036_v7 = vpop.f32.mrb[12].mxu1 }
 0x146   : > { %v845_v30 = vpop.f32.mrb[13].mxu0  ;;  %v1038_v31 = vpop.f32.mrb[13].mxu1 }
 0x147   : > { %v847_v32 = vpop.f32.mrb[14].mxu0  ;;  %v1040_v34 = vpop.f32.mrb[14].mxu1 }
 0x148   : > { %v4916_v33 = vpack.c.bf16 %v847_v32, %v843_v29  ;;  %v849_v35 = vpop.f32.mrb[15].mxu0  ;;  %v4918_v36 = vpack.c.bf16 %v1040_v34, %v1036_v7  ;;  %v1042_v22 = vpop.f32.mrb[15].mxu1 }
 0x149   : > { %v4920_v19 = vpack.c.bf16 %v849_v35, %v845_v30  ;;  %v4924_v37 = vpack.c.bf16 %v1042_v22, %v1038_v31 }
 0x14a   : > { %3948 = vst [vmem:[%s4860_s17 + $0x18] sm:$0xff] %v4916_v33   ;;  %1338 = vmatmul.mubr.bf16.gmra.mrb[120].mxu0 %v4703_v20  ;;  %3980 = vst [vmem:[%s4860_s17 + $0x118] sm:$0xff] %v4918_v36   ;;  %1531 = vmatmul.mubr.bf16.gmra.mrb[120].mxu1 %v4703_v20 }
 0x14b   : > { %3964 = vst [vmem:[%s4860_s17 + $0x98] sm:$0xff] %v4920_v19   ;;  %1347 = vmatprep.mubr.bf16.mxu0 %v4457_v0  ;;  %3996 = vst [vmem:[%s4860_s17 + $0x198] sm:$0xff] %v4924_v37   ;;  %1540 = vmatprep.mubr.bf16.mxu1 %v4457_v0 }
 0x14d   : > { %v853_v39 = vpop.f32.mrb[16].mxu0  ;;  %v1046_v40 = vpop.f32.mrb[16].mxu1 }
 0x14e   : > { %v855_v41 = vpop.f32.mrb[17].mxu0  ;;  %v1048_v42 = vpop.f32.mrb[17].mxu1 }
 0x14f   : > { %v857_v43 = vpop.f32.mrb[18].mxu0  ;;  %v1050_v38 = vpop.f32.mrb[18].mxu1 }
 0x150   : > { %v4936_v44 = vpack.c.bf16 %v857_v43, %v853_v39  ;;  %v859_v45 = vpop.f32.mrb[19].mxu0  ;;  %v4938_v46 = vpack.c.bf16 %v1050_v38, %v1046_v40  ;;  %v1052_v47 = vpop.f32.mrb[19].mxu1 }
 0x151   : > { %v4940_v20 = vpack.c.bf16 %v859_v45, %v855_v41  ;;  %v4944_v48 = vpack.c.bf16 %v1052_v47, %v1048_v42 }
 0x152   : > { %3949 = vst [vmem:[%s4860_s17 + $0x20] sm:$0xff] %v4936_v44   ;;  %1348 = vmatmul.mubr.bf16.gmra.mrb[124].mxu0 %v4710_v21  ;;  %3981 = vst [vmem:[%s4860_s17 + $0x120] sm:$0xff] %v4938_v46   ;;  %1541 = vmatmul.mubr.bf16.gmra.mrb[124].mxu1 %v4710_v21 }
 0x153   : > { %3965 = vst [vmem:[%s4860_s17 + $0xa0] sm:$0xff] %v4940_v20   ;;  %2610 = vmatprep.mubr.bf16.mxu0 %v4858_v60  ;;  %3997 = vst [vmem:[%s4860_s17 + $0x1a0] sm:$0xff] %v4944_v48   ;;  %2771 = vmatprep.mubr.bf16.mxu1 %v4864_v62 }
 0x155   : > { %v863_v0 = vpop.f32.mrb[20].mxu0  ;;  %v1056_v49 = vpop.f32.mrb[20].mxu1 }
 0x156   : > { %v865_v50 = vpop.f32.mrb[21].mxu0  ;;  %v1058_v51 = vpop.f32.mrb[21].mxu1 }
 0x157   : > { %v867_v52 = vpop.f32.mrb[22].mxu0  ;;  %v1060_v54 = vpop.f32.mrb[22].mxu1 }
 0x158   : > { %v4956_v53 = vpack.c.bf16 %v867_v52, %v863_v0  ;;  %v869_v55 = vpop.f32.mrb[23].mxu0  ;;  %v4958_v57 = vpack.c.bf16 %v1060_v54, %v1056_v49  ;;  %v1062_v58 = vpop.f32.mrb[23].mxu1 }
 0x159   : > { %v4960_v21 = vpack.c.bf16 %v869_v55, %v865_v50  ;;  %v4964_v60 = vpack.c.bf16 %v1062_v58, %v1058_v51 }
 0x15a   : > { %3950 = vst [vmem:[%s4860_s17 + $0x28] sm:$0xff] %v4956_v53   ;;  %2611 = vmatmul.mubr.bf16.vlgmr.msra.gmra.mrb[128].mxu0 %v4854_v56  ;;  %3982 = vst [vmem:[%s4860_s17 + $0x128] sm:$0xff] %v4958_v57   ;;  %2772 = vmatmul.mubr.bf16.vlgmr.msra.gmra.mrb[128].mxu1 %v4856_v59 }
 0x15b   : > { %3966 = vst [vmem:[%s4860_s17 + $0xa8] sm:$0xff] %v4960_v21   ;;  %2618 = vmatprep.mubr.bf16.mxu0 %v4880_v10  ;;  %3998 = vst [vmem:[%s4860_s17 + $0x1a8] sm:$0xff] %v4964_v60   ;;  %2779 = vmatprep.mubr.bf16.mxu1 %v4884_v12 }
 0x15d   : > { %v873_v61 = vpop.f32.mrb[24].mxu0  ;;  %v1066_v62 = vpop.f32.mrb[24].mxu1 }
 0x15e   : > { %v875_v63 = vpop.f32.mrb[25].mxu0  ;;  %v1068_v56 = vpop.f32.mrb[25].mxu1 }
 0x15f   : > { %v877_v1 = vpop.f32.mrb[26].mxu0  ;;  %v1070_v3 = vpop.f32.mrb[26].mxu1 }
 0x160   : > { %v4976_v2 = vpack.c.bf16 %v877_v1, %v873_v61  ;;  %v879_v4 = vpop.f32.mrb[27].mxu0  ;;  %v4978_v6 = vpack.c.bf16 %v1070_v3, %v1066_v62  ;;  %v1072_v8 = vpop.f32.mrb[27].mxu1 }
 0x161   : > { %v4980_v59 = vpack.c.bf16 %v879_v4, %v875_v63  ;;  %v4984_v10 = vpack.c.bf16 %v1072_v8, %v1068_v56 }
 0x162   : > { %3951 = vst [vmem:[%s4860_s17 + $0x30] sm:$0xff] %v4976_v2   ;;  %2619 = vmatmul.mubr.bf16.gmra.mrb[132].mxu0 %v4876_v5  ;;  %3983 = vst [vmem:[%s4860_s17 + $0x130] sm:$0xff] %v4978_v6   ;;  %2780 = vmatmul.mubr.bf16.gmra.mrb[132].mxu1 %v4878_v9 }
 0x163   : > { %3967 = vst [vmem:[%s4860_s17 + $0xb0] sm:$0xff] %v4980_v59   ;;  %2626 = vmatprep.mubr.bf16.mxu0 %v4900_v18  ;;  %3999 = vst [vmem:[%s4860_s17 + $0x1b0] sm:$0xff] %v4984_v10   ;;  %2787 = vmatprep.mubr.bf16.mxu1 %v4904_v28 }
 0x165   : > { %v883_v11 = vpop.f32.mrb[28].mxu0  ;;  %v1076_v12 = vpop.f32.mrb[28].mxu1 }
 0x166   : > { %v885_v13 = vpop.f32.mrb[29].mxu0  ;;  %v1078_v5 = vpop.f32.mrb[29].mxu1 }
 0x167   : > { %v887_v14 = vpop.f32.mrb[30].mxu0  ;;  %v1080_v16 = vpop.f32.mrb[30].mxu1 }
 0x168   : > { %v4996_v15 = vpack.c.bf16 %v887_v14, %v883_v11  ;;  %v889_v17 = vpop.f32.mrb[31].mxu0  ;;  %v4998_v24 = vpack.c.bf16 %v1080_v16, %v1076_v12  ;;  %v1082_v25 = vpop.f32.mrb[31].mxu1 }
 0x169   : > { %v5000_v9 = vpack.c.bf16 %v889_v17, %v885_v13  ;;  %v5004_v18 = vpack.c.bf16 %v1082_v25, %v1078_v5 }
 0x16a   : > { %3952 = vst [vmem:[%s4860_s17 + $0x38] sm:$0xff] %v4996_v15   ;;  %2627 = vmatmul.mubr.bf16.gmra.mrb[136].mxu0 %v4896_v23  ;;  %3984 = vst [vmem:[%s4860_s17 + $0x138] sm:$0xff] %v4998_v24   ;;  %2788 = vmatmul.mubr.bf16.gmra.mrb[136].mxu1 %v4898_v26 }
 0x16b   : > { %3968 = vst [vmem:[%s4860_s17 + $0xb8] sm:$0xff] %v5000_v9   ;;  %2634 = vmatprep.mubr.bf16.mxu0 %v4920_v19  ;;  %4000 = vst [vmem:[%s4860_s17 + $0x1b8] sm:$0xff] %v5004_v18   ;;  %2795 = vmatprep.mubr.bf16.mxu1 %v4924_v37 }
 0x16d   : > { %v893_v27 = vpop.f32.mrb[32].mxu0  ;;  %v1086_v28 = vpop.f32.mrb[32].mxu1 }
 0x16e   : > { %v895_v29 = vpop.f32.mrb[33].mxu0  ;;  %v1088_v23 = vpop.f32.mrb[33].mxu1 }
 0x16f   : > { %v897_v7 = vpop.f32.mrb[34].mxu0  ;;  %v1090_v31 = vpop.f32.mrb[34].mxu1 }
 0x170   : > { %v5016_v30 = vpack.c.bf16 %v897_v7, %v893_v27  ;;  %v899_v32 = vpop.f32.mrb[35].mxu0  ;;  %v5018_v34 = vpack.c.bf16 %v1090_v31, %v1086_v28  ;;  %v1092_v35 = vpop.f32.mrb[35].mxu1 }
 0x171   : > { %v5020_v26 = vpack.c.bf16 %v899_v32, %v895_v29  ;;  %v5024_v19 = vpack.c.bf16 %v1092_v35, %v1088_v23 }
 0x172   : > { %3953 = vst [vmem:[%s4860_s17 + $0x40] sm:$0xff] %v5016_v30   ;;  %2635 = vmatmul.mubr.bf16.gmra.mrb[140].mxu0 %v4916_v33  ;;  %3985 = vst [vmem:[%s4860_s17 + $0x140] sm:$0xff] %v5018_v34   ;;  %2796 = vmatmul.mubr.bf16.gmra.mrb[140].mxu1 %v4918_v36 }
 0x173   : > { %3969 = vst [vmem:[%s4860_s17 + $0xc0] sm:$0xff] %v5020_v26   ;;  %2642 = vmatprep.mubr.bf16.mxu0 %v4940_v20  ;;  %4001 = vst [vmem:[%s4860_s17 + $0x1c0] sm:$0xff] %v5024_v19   ;;  %2803 = vmatprep.mubr.bf16.mxu1 %v4944_v48 }
 0x175   : > { %v903_v22 = vpop.f32.mrb[36].mxu0  ;;  %v1096_v37 = vpop.f32.mrb[36].mxu1 }
 0x176   : > { %v905_v39 = vpop.f32.mrb[37].mxu0  ;;  %v1098_v33 = vpop.f32.mrb[37].mxu1 }
 0x177   : > { %v907_v40 = vpop.f32.mrb[38].mxu0  ;;  %v1100_v42 = vpop.f32.mrb[38].mxu1 }
 0x178   : > { %v5036_v41 = vpack.c.bf16 %v907_v40, %v903_v22  ;;  %v909_v43 = vpop.f32.mrb[39].mxu0  ;;  %v5038_v38 = vpack.c.bf16 %v1100_v42, %v1096_v37  ;;  %v1102_v45 = vpop.f32.mrb[39].mxu1 }
 0x179   : > { %v5040_v36 = vpack.c.bf16 %v909_v43, %v905_v39  ;;  %v5044_v20 = vpack.c.bf16 %v1102_v45, %v1098_v33 }
 0x17a   : > { %3954 = vst [vmem:[%s4860_s17 + $0x48] sm:$0xff] %v5036_v41   ;;  %2643 = vmatmul.mubr.bf16.gmra.mrb[144].mxu0 %v4936_v44  ;;  %3986 = vst [vmem:[%s4860_s17 + $0x148] sm:$0xff] %v5038_v38   ;;  %2804 = vmatmul.mubr.bf16.gmra.mrb[144].mxu1 %v4938_v46 }
 0x17b   : > { %3970 = vst [vmem:[%s4860_s17 + $0xc8] sm:$0xff] %v5040_v36   ;;  %2650 = vmatprep.mubr.bf16.mxu0 %v4960_v21  ;;  %4002 = vst [vmem:[%s4860_s17 + $0x1c8] sm:$0xff] %v5044_v20   ;;  %2811 = vmatprep.mubr.bf16.mxu1 %v4964_v60 }
 0x17d   : > { %v913_v47 = vpop.f32.mrb[40].mxu0  ;;  %v1106_v48 = vpop.f32.mrb[40].mxu1 }
 0x17e   : > { %v915_v0 = vpop.f32.mrb[41].mxu0  ;;  %v1108_v44 = vpop.f32.mrb[41].mxu1 }
 0x17f   : > { %v917_v49 = vpop.f32.mrb[42].mxu0  ;;  %v1110_v51 = vpop.f32.mrb[42].mxu1 }
 0x180   : > { %v5056_v50 = vpack.c.bf16 %v917_v49, %v913_v47  ;;  %v919_v52 = vpop.f32.mrb[43].mxu0  ;;  %v5058_v54 = vpack.c.bf16 %v1110_v51, %v1106_v48  ;;  %v1112_v55 = vpop.f32.mrb[43].mxu1 }
 0x181   : > { %v5060_v46 = vpack.c.bf16 %v919_v52, %v915_v0  ;;  %v5064_v21 = vpack.c.bf16 %v1112_v55, %v1108_v44 }
 0x182   : > { %3955 = vst [vmem:[%s4860_s17 + $0x50] sm:$0xff] %v5056_v50   ;;  %2651 = vmatmul.mubr.bf16.gmra.mrb[148].mxu0 %v4956_v53  ;;  %3987 = vst [vmem:[%s4860_s17 + $0x150] sm:$0xff] %v5058_v54   ;;  %2812 = vmatmul.mubr.bf16.gmra.mrb[148].mxu1 %v4958_v57 }
 0x183   : > { %3971 = vst [vmem:[%s4860_s17 + $0xd0] sm:$0xff] %v5060_v46   ;;  %2658 = vmatprep.mubr.bf16.mxu0 %v4980_v59  ;;  %4003 = vst [vmem:[%s4860_s17 + $0x1d0] sm:$0xff] %v5064_v21   ;;  %2819 = vmatprep.mubr.bf16.mxu1 %v4984_v10 }
 0x185   : > { %v923_v58 = vpop.f32.mrb[44].mxu0  ;;  %v1116_v60 = vpop.f32.mrb[44].mxu1 }
 0x186   : > { %v925_v61 = vpop.f32.mrb[45].mxu0  ;;  %v1118_v53 = vpop.f32.mrb[45].mxu1 }
 0x187   : > { %v927_v62 = vpop.f32.mrb[46].mxu0  ;;  %v1120_v56 = vpop.f32.mrb[46].mxu1 }
 0x188   : > { %v5076_v63 = vpack.c.bf16 %v927_v62, %v923_v58  ;;  %v929_v1 = vpop.f32.mrb[47].mxu0  ;;  %v5078_v3 = vpack.c.bf16 %v1120_v56, %v1116_v60  ;;  %v1122_v4 = vpop.f32.mrb[47].mxu1 }
 0x189   : > { %v5080_v57 = vpack.c.bf16 %v929_v1, %v925_v61  ;;  %v5084_v59 = vpack.c.bf16 %v1122_v4, %v1118_v53 }
 0x18a   : > { %3956 = vst [vmem:[%s4860_s17 + $0x58] sm:$0xff] %v5076_v63   ;;  %2659 = vmatmul.mubr.bf16.gmra.mrb[152].mxu0 %v4976_v2  ;;  %3988 = vst [vmem:[%s4860_s17 + $0x158] sm:$0xff] %v5078_v3   ;;  %2820 = vmatmul.mubr.bf16.gmra.mrb[152].mxu1 %v4978_v6 }
 0x18b   : > { %3972 = vst [vmem:[%s4860_s17 + $0xd8] sm:$0xff] %v5080_v57   ;;  %2666 = vmatprep.mubr.bf16.mxu0 %v5000_v9  ;;  %4004 = vst [vmem:[%s4860_s17 + $0x1d8] sm:$0xff] %v5084_v59   ;;  %2827 = vmatprep.mubr.bf16.mxu1 %v5004_v18 }
 0x18d   : > { %v933_v8 = vpop.f32.mrb[48].mxu0  ;;  %v1126_v10 = vpop.f32.mrb[48].mxu1 }
 0x18e   : > { %v935_v11 = vpop.f32.mrb[49].mxu0  ;;  %v1128_v2 = vpop.f32.mrb[49].mxu1 }
 0x18f   : > { %v937_v12 = vpop.f32.mrb[50].mxu0  ;;  %v1130_v5 = vpop.f32.mrb[50].mxu1 }
 0x190   : > { %v5096_v13 = vpack.c.bf16 %v937_v12, %v933_v8  ;;  %v939_v14 = vpop.f32.mrb[51].mxu0  ;;  %v5098_v16 = vpack.c.bf16 %v1130_v5, %v1126_v10  ;;  %v1132_v17 = vpop.f32.mrb[51].mxu1 }
 0x191   : > { %v5100_v6 = vpack.c.bf16 %v939_v14, %v935_v11  ;;  %v5104_v9 = vpack.c.bf16 %v1132_v17, %v1128_v2 }
 0x192   : > { %3957 = vst [vmem:[%s4860_s17 + $0x60] sm:$0xff] %v5096_v13   ;;  %2667 = vmatmul.mubr.bf16.gmra.mrb[156].mxu0 %v4996_v15  ;;  %3989 = vst [vmem:[%s4860_s17 + $0x160] sm:$0xff] %v5098_v16   ;;  %2828 = vmatmul.mubr.bf16.gmra.mrb[156].mxu1 %v4998_v24 }
 0x193   : > { %3973 = vst [vmem:[%s4860_s17 + $0xe0] sm:$0xff] %v5100_v6   ;;  %2674 = vmatprep.mubr.bf16.mxu0 %v5020_v26  ;;  %4005 = vst [vmem:[%s4860_s17 + $0x1e0] sm:$0xff] %v5104_v9   ;;  %2835 = vmatprep.mubr.bf16.mxu1 %v5024_v19 }
 0x195   : > { %v943_v25 = vpop.f32.mrb[52].mxu0  ;;  %v1136_v18 = vpop.f32.mrb[52].mxu1 }
 0x196   : > { %v945_v27 = vpop.f32.mrb[53].mxu0  ;;  %v1138_v15 = vpop.f32.mrb[53].mxu1 }
 0x197   : > { %v947_v28 = vpop.f32.mrb[54].mxu0  ;;  %v1140_v23 = vpop.f32.mrb[54].mxu1 }
 0x198   : > { %v5116_v29 = vpack.c.bf16 %v947_v28, %v943_v25  ;;  %v949_v7 = vpop.f32.mrb[55].mxu0  ;;  %v5118_v31 = vpack.c.bf16 %v1140_v23, %v1136_v18  ;;  %v1142_v32 = vpop.f32.mrb[55].mxu1 }
 0x199   : > { %v5120_v24 = vpack.c.bf16 %v949_v7, %v945_v27  ;;  %v5124_v26 = vpack.c.bf16 %v1142_v32, %v1138_v15 }
 0x19a   : > { %3958 = vst [vmem:[%s4860_s17 + $0x68] sm:$0xff] %v5116_v29   ;;  %2675 = vmatmul.mubr.bf16.gmra.mrb[160].mxu0 %v5016_v30  ;;  %3990 = vst [vmem:[%s4860_s17 + $0x168] sm:$0xff] %v5118_v31   ;;  %2836 = vmatmul.mubr.bf16.gmra.mrb[160].mxu1 %v5018_v34 }
 0x19b   : > { %3974 = vst [vmem:[%s4860_s17 + $0xe8] sm:$0xff] %v5120_v24   ;;  %2682 = vmatprep.mubr.bf16.mxu0 %v5040_v36  ;;  %4006 = vst [vmem:[%s4860_s17 + $0x1e8] sm:$0xff] %v5124_v26   ;;  %2843 = vmatprep.mubr.bf16.mxu1 %v5044_v20 }
 0x19d   : > { %v953_v35 = vpop.f32.mrb[56].mxu0  ;;  %v1146_v19 = vpop.f32.mrb[56].mxu1 }
 0x19e   : > { %v955_v22 = vpop.f32.mrb[57].mxu0  ;;  %v1148_v30 = vpop.f32.mrb[57].mxu1 }
 0x19f   : > { %v957_v37 = vpop.f32.mrb[58].mxu0  ;;  %v1150_v33 = vpop.f32.mrb[58].mxu1 }
 0x1a0   : > { %v5136_v39 = vpack.c.bf16 %v957_v37, %v953_v35  ;;  %v959_v40 = vpop.f32.mrb[59].mxu0  ;;  %v5138_v42 = vpack.c.bf16 %v1150_v33, %v1146_v19  ;;  %v1152_v43 = vpop.f32.mrb[59].mxu1 }
 0x1a1   : > { %v5140_v34 = vpack.c.bf16 %v959_v40, %v955_v22  ;;  %v5144_v36 = vpack.c.bf16 %v1152_v43, %v1148_v30 }
 0x1a2   : > { %3959 = vst [vmem:[%s4860_s17 + $0x70] sm:$0xff] %v5136_v39   ;;  %2683 = vmatmul.mubr.bf16.gmra.mrb[164].mxu0 %v5036_v41  ;;  %3991 = vst [vmem:[%s4860_s17 + $0x170] sm:$0xff] %v5138_v42   ;;  %2844 = vmatmul.mubr.bf16.gmra.mrb[164].mxu1 %v5038_v38 }
 0x1a3   : > { %3975 = vst [vmem:[%s4860_s17 + $0xf0] sm:$0xff] %v5140_v34   ;;  %2690 = vmatprep.mubr.bf16.mxu0 %v5060_v46  ;;  %4007 = vst [vmem:[%s4860_s17 + $0x1f0] sm:$0xff] %v5144_v36   ;;  %2851 = vmatprep.mubr.bf16.mxu1 %v5064_v21 }
 0x1a5   : > { %v963_v45 = vpop.f32.mrb[60].mxu0  ;;  %v1156_v20 = vpop.f32.mrb[60].mxu1 }
 0x1a6   : > { %v965_v47 = vpop.f32.mrb[61].mxu0  ;;  %v1158_v48 = vpop.f32.mrb[61].mxu1 }
 0x1a7   : > { %v967_v41 = vpop.f32.mrb[62].mxu0  ;;  %v1160_v44 = vpop.f32.mrb[62].mxu1 }
 0x1a8   : > { %v5156_v0 = vpack.c.bf16 %v967_v41, %v963_v45  ;;  %v969_v49 = vpop.f32.mrb[63].mxu0  ;;  %v5159_v38 = vpack.c.bf16 %v1160_v44, %v1156_v20  ;;  %v1162_v52 = vpop.f32.mrb[63].mxu1 }
 0x1a9   : > { %v5161_v51 = vpack.c.bf16 %v969_v49, %v965_v47  ;;  %v5165_v46 = vpack.c.bf16 %v1162_v52, %v1158_v48 }
 0x1aa   : > { %3960 = vst [vmem:[%s4860_s17 + $0x78] sm:$0xff] %v5156_v0   ;;  %2691 = vmatmul.mubr.bf16.gmra.mrb[168].mxu0 %v5056_v50  ;;  %3992 = vst [vmem:[%s4860_s17 + $0x178] sm:$0xff] %v5159_v38   ;;  %2852 = vmatmul.mubr.bf16.gmra.mrb[168].mxu1 %v5058_v54 }
 0x1ab   : > { %3976 = vst [vmem:[%s4860_s17 + $0xf8] sm:$0xff] %v5161_v51   ;;  %2698 = vmatprep.mubr.bf16.mxu0 %v5080_v57  ;;  %4008 = vst [vmem:[%s4860_s17 + $0x1f8] sm:$0xff] %v5165_v46   ;;  %2859 = vmatprep.mubr.bf16.mxu1 %v5084_v59 }
 0x1ad   : > { %v1199_v55 = vpop.f32.mrb[64].mxu0  ;;  %v1392_v50 = vpop.f32.mrb[64].mxu1 }
 0x1ae   : > { %1551 = vst [vmem:[%s5177_s25] sm:$0xff] %v1199_v55  ;;  %v1201_v54 = vpop.f32.mrb[65].mxu0  ;;  %1553 = vst [vmem:[%s5177_s25 + $0x10] sm:$0xff] %v1392_v50  ;;  %v1394_v21 = vpop.f32.mrb[65].mxu1 }
 0x1af   : > { %1552 = vst [vmem:[%s5177_s25 + $0x8] sm:$0xff] %v1201_v54  ;;  %v1203_v58 = vpop.f32.mrb[66].mxu0  ;;  %1554 = vst [vmem:[%s5177_s25 + $0x18] sm:$0xff] %v1394_v21  ;;  %v1396_v60 = vpop.f32.mrb[66].mxu1 }
 0x1b0   : > { %1555 = vst [vmem:[%s5177_s25 + $0x20] sm:$0xff] %v1203_v58  ;;  %v1205_v61 = vpop.f32.mrb[67].mxu0  ;;  %1557 = vst [vmem:[%s5177_s25 + $0x30] sm:$0xff] %v1396_v60  ;;  %v1398_v53 = vpop.f32.mrb[67].mxu1 }
 0x1b1   : > { %1556 = vst [vmem:[%s5177_s25 + $0x28] sm:$0xff] %v1205_v61  ;;  %1558 = vst [vmem:[%s5177_s25 + $0x38] sm:$0xff] %v1398_v53 }
 0x1b2   : > { %2699 = vmatmul.mubr.bf16.gmra.mrb[172].mxu0 %v5076_v63  ;;  %2860 = vmatmul.mubr.bf16.gmra.mrb[172].mxu1 %v5078_v3 }
 0x1b3   : > { %2706 = vmatprep.mubr.bf16.mxu0 %v5100_v6  ;;  %2867 = vmatprep.mubr.bf16.mxu1 %v5104_v9 }
 0x1b5   : > { %v1209_v62 = vpop.f32.mrb[68].mxu0  ;;  %v1402_v56 = vpop.f32.mrb[68].mxu1 }
 0x1b6   : > { %1559 = vst [vmem:[%s5177_s25 + $0x40] sm:$0xff] %v1209_v62  ;;  %v1211_v1 = vpop.f32.mrb[69].mxu0  ;;  %1561 = vst [vmem:[%s5177_s25 + $0x50] sm:$0xff] %v1402_v56  ;;  %v1404_v57 = vpop.f32.mrb[69].mxu1 }
 0x1b7   : > { %1560 = vst [vmem:[%s5177_s25 + $0x48] sm:$0xff] %v1211_v1  ;;  %v1213_v4 = vpop.f32.mrb[70].mxu0  ;;  %1562 = vst [vmem:[%s5177_s25 + $0x58] sm:$0xff] %v1404_v57  ;;  %v1406_v63 = vpop.f32.mrb[70].mxu1 }
 0x1b8   : > { %1563 = vst [vmem:[%s5177_s25 + $0x60] sm:$0xff] %v1213_v4  ;;  %v1215_v3 = vpop.f32.mrb[71].mxu0  ;;  %1565 = vst [vmem:[%s5177_s25 + $0x70] sm:$0xff] %v1406_v63  ;;  %v1408_v59 = vpop.f32.mrb[71].mxu1 }
 0x1b9   : > { %1564 = vst [vmem:[%s5177_s25 + $0x68] sm:$0xff] %v1215_v3  ;;  %1566 = vst [vmem:[%s5177_s25 + $0x78] sm:$0xff] %v1408_v59 }
 0x1ba   : > { %2707 = vmatmul.mubr.bf16.gmra.mrb[176].mxu0 %v5096_v13  ;;  %2868 = vmatmul.mubr.bf16.gmra.mrb[176].mxu1 %v5098_v16 }
 0x1bb   : > { %2714 = vmatprep.mubr.bf16.mxu0 %v5120_v24  ;;  %2875 = vmatprep.mubr.bf16.mxu1 %v5124_v26 }
 0x1bd   : > { %v1219_v8 = vpop.f32.mrb[72].mxu0  ;;  %v1412_v10 = vpop.f32.mrb[72].mxu1 }
 0x1be   : > { %1567 = vst [vmem:[%s5177_s25 + $0x80] sm:$0xff] %v1219_v8  ;;  %v1221_v11 = vpop.f32.mrb[73].mxu0  ;;  %1569 = vst [vmem:[%s5177_s25 + $0x90] sm:$0xff] %v1412_v10  ;;  %v1414_v2 = vpop.f32.mrb[73].mxu1 }
 0x1bf   : > { %1568 = vst [vmem:[%s5177_s25 + $0x88] sm:$0xff] %v1221_v11  ;;  %v1223_v12 = vpop.f32.mrb[74].mxu0  ;;  %1570 = vst [vmem:[%s5177_s25 + $0x98] sm:$0xff] %v1414_v2  ;;  %v1416_v13 = vpop.f32.mrb[74].mxu1 }
 0x1c0   : > { %1571 = vst [vmem:[%s5177_s25 + $0xa0] sm:$0xff] %v1223_v12  ;;  %v1225_v5 = vpop.f32.mrb[75].mxu0  ;;  %1573 = vst [vmem:[%s5177_s25 + $0xb0] sm:$0xff] %v1416_v13  ;;  %v1418_v14 = vpop.f32.mrb[75].mxu1 }
 0x1c1   : > { %1572 = vst [vmem:[%s5177_s25 + $0xa8] sm:$0xff] %v1225_v5  ;;  %1574 = vst [vmem:[%s5177_s25 + $0xb8] sm:$0xff] %v1418_v14 }
 0x1c2   : > { %2715 = vmatmul.mubr.bf16.gmra.mrb[180].mxu0 %v5116_v29  ;;  %2876 = vmatmul.mubr.bf16.gmra.mrb[180].mxu1 %v5118_v31 }
 0x1c3   : > { %2722 = vmatprep.mubr.bf16.mxu0 %v5140_v34  ;;  %2883 = vmatprep.mubr.bf16.mxu1 %v5144_v36 }
 0x1c5   : > { %v1229_v16 = vpop.f32.mrb[76].mxu0  ;;  %v1422_v6 = vpop.f32.mrb[76].mxu1 }
 0x1c6   : > { %1575 = vst [vmem:[%s5177_s25 + $0xc0] sm:$0xff] %v1229_v16  ;;  %v1231_v17 = vpop.f32.mrb[77].mxu0  ;;  %1577 = vst [vmem:[%s5177_s25 + $0xd0] sm:$0xff] %v1422_v6  ;;  %v1424_v9 = vpop.f32.mrb[77].mxu1 }
 0x1c7   : > { %1576 = vst [vmem:[%s5177_s25 + $0xc8] sm:$0xff] %v1231_v17  ;;  %v1233_v25 = vpop.f32.mrb[78].mxu0  ;;  %1578 = vst [vmem:[%s5177_s25 + $0xd8] sm:$0xff] %v1424_v9  ;;  %v1426_v18 = vpop.f32.mrb[78].mxu1 }
 0x1c8   : > { %1579 = vst [vmem:[%s5177_s25 + $0xe0] sm:$0xff] %v1233_v25  ;;  %v1235_v27 = vpop.f32.mrb[79].mxu0  ;;  %1581 = vst [vmem:[%s5177_s25 + $0xf0] sm:$0xff] %v1426_v18  ;;  %v1428_v15 = vpop.f32.mrb[79].mxu1 }
 0x1c9   : > { %1580 = vst [vmem:[%s5177_s25 + $0xe8] sm:$0xff] %v1235_v27  ;;  %1582 = vst [vmem:[%s5177_s25 + $0xf8] sm:$0xff] %v1428_v15 }
 0x1ca   : > { %2723 = vmatmul.mubr.bf16.gmra.mrb[184].mxu0 %v5136_v39  ;;  %2884 = vmatmul.mubr.bf16.gmra.mrb[184].mxu1 %v5138_v42 }
 0x1cb   : > { %2730 = vmatprep.mubr.bf16.mxu0 %v5161_v51  ;;  %2891 = vmatprep.mubr.bf16.mxu1 %v5165_v46 }
 0x1cd   : > { %v1239_v28 = vpop.f32.mrb[80].mxu0  ;;  %v1432_v29 = vpop.f32.mrb[80].mxu1 }
 0x1ce   : > { %1583 = vst [vmem:[%s5177_s25 + $0x100] sm:$0xff] %v1239_v28  ;;  %v1241_v23 = vpop.f32.mrb[81].mxu0  ;;  %1585 = vst [vmem:[%s5177_s25 + $0x110] sm:$0xff] %v1432_v29  ;;  %v1434_v7 = vpop.f32.mrb[81].mxu1 }
 0x1cf   : > { %1584 = vst [vmem:[%s5177_s25 + $0x108] sm:$0xff] %v1241_v23  ;;  %v1243_v31 = vpop.f32.mrb[82].mxu0  ;;  %1586 = vst [vmem:[%s5177_s25 + $0x118] sm:$0xff] %v1434_v7  ;;  %v1436_v24 = vpop.f32.mrb[82].mxu1 }
 0x1d0   : > { %1587 = vst [vmem:[%s5177_s25 + $0x120] sm:$0xff] %v1243_v31  ;;  %v1245_v32 = vpop.f32.mrb[83].mxu0  ;;  %1589 = vst [vmem:[%s5177_s25 + $0x130] sm:$0xff] %v1436_v24  ;;  %v1438_v26 = vpop.f32.mrb[83].mxu1 }
 0x1d1   : > { %1588 = vst [vmem:[%s5177_s25 + $0x128] sm:$0xff] %v1245_v32  ;;  %1590 = vst [vmem:[%s5177_s25 + $0x138] sm:$0xff] %v1438_v26 }
 0x1d2   : > { %2731 = vmatmul.mubr.bf16.gmra.mrb[188].mxu0 %v5156_v0  ;;  %2892 = vmatmul.mubr.bf16.gmra.mrb[188].mxu1 %v5159_v38 }
 0x1d5   : > { %v1249_v35 = vpop.f32.mrb[84].mxu0  ;;  %v1442_v19 = vpop.f32.mrb[84].mxu1 }
 0x1d6   : > { %1591 = vst [vmem:[%s5177_s25 + $0x140] sm:$0xff] %v1249_v35  ;;  %v1251_v22 = vpop.f32.mrb[85].mxu0  ;;  %1593 = vst [vmem:[%s5177_s25 + $0x150] sm:$0xff] %v1442_v19  ;;  %v1444_v30 = vpop.f32.mrb[85].mxu1 }
 0x1d7   : > { %1592 = vst [vmem:[%s5177_s25 + $0x148] sm:$0xff] %v1251_v22  ;;  %v1253_v37 = vpop.f32.mrb[86].mxu0  ;;  %1594 = vst [vmem:[%s5177_s25 + $0x158] sm:$0xff] %v1444_v30  ;;  %v1446_v39 = vpop.f32.mrb[86].mxu1 }
 0x1d8   : > { %1595 = vst [vmem:[%s5177_s25 + $0x160] sm:$0xff] %v1253_v37  ;;  %v1255_v33 = vpop.f32.mrb[87].mxu0  ;;  %1597 = vst [vmem:[%s5177_s25 + $0x170] sm:$0xff] %v1446_v39  ;;  %v1448_v40 = vpop.f32.mrb[87].mxu1 }
 0x1d9   : > { %1596 = vst [vmem:[%s5177_s25 + $0x168] sm:$0xff] %v1255_v33  ;;  %1598 = vst [vmem:[%s5177_s25 + $0x178] sm:$0xff] %v1448_v40 }
 0x1dd   : > { %v1259_v42 = vpop.f32.mrb[88].mxu0  ;;  %v1452_v34 = vpop.f32.mrb[88].mxu1 }
 0x1de   : > { %1599 = vst [vmem:[%s5177_s25 + $0x180] sm:$0xff] %v1259_v42  ;;  %v1261_v43 = vpop.f32.mrb[89].mxu0  ;;  %1601 = vst [vmem:[%s5177_s25 + $0x190] sm:$0xff] %v1452_v34  ;;  %v1454_v36 = vpop.f32.mrb[89].mxu1 }
 0x1df   : > { %1600 = vst [vmem:[%s5177_s25 + $0x188] sm:$0xff] %v1261_v43  ;;  %v1263_v45 = vpop.f32.mrb[90].mxu0  ;;  %1602 = vst [vmem:[%s5177_s25 + $0x198] sm:$0xff] %v1454_v36  ;;  %v1456_v20 = vpop.f32.mrb[90].mxu1 }
 0x1e0   : > { %1603 = vst [vmem:[%s5177_s25 + $0x1a0] sm:$0xff] %v1263_v45  ;;  %v1265_v47 = vpop.f32.mrb[91].mxu0  ;;  %1605 = vst [vmem:[%s5177_s25 + $0x1b0] sm:$0xff] %v1456_v20  ;;  %v1458_v48 = vpop.f32.mrb[91].mxu1 }
 0x1e1   : > { %1604 = vst [vmem:[%s5177_s25 + $0x1a8] sm:$0xff] %v1265_v47  ;;  %1606 = vst [vmem:[%s5177_s25 + $0x1b8] sm:$0xff] %v1458_v48 }
 0x1e5   : > { %v1269_v41 = vpop.f32.mrb[92].mxu0  ;;  %v1462_v0 = vpop.f32.mrb[92].mxu1 }
 0x1e6   : > { %1607 = vst [vmem:[%s5177_s25 + $0x1c0] sm:$0xff] %v1269_v41  ;;  %v1271_v44 = vpop.f32.mrb[93].mxu0  ;;  %1609 = vst [vmem:[%s5177_s25 + $0x1d0] sm:$0xff] %v1462_v0  ;;  %v1464_v49 = vpop.f32.mrb[93].mxu1 }
 0x1e7   : > { %1608 = vst [vmem:[%s5177_s25 + $0x1c8] sm:$0xff] %v1271_v44  ;;  %v1273_v38 = vpop.f32.mrb[94].mxu0  ;;  %1610 = vst [vmem:[%s5177_s25 + $0x1d8] sm:$0xff] %v1464_v49  ;;  %v1466_v51 = vpop.f32.mrb[94].mxu1 }
 0x1e8   : > { %1611 = vst [vmem:[%s5177_s25 + $0x1e0] sm:$0xff] %v1273_v38  ;;  %v1275_v52 = vpop.f32.mrb[95].mxu0  ;;  %1613 = vst [vmem:[%s5177_s25 + $0x1f0] sm:$0xff] %v1466_v51  ;;  %v1468_v46 = vpop.f32.mrb[95].mxu1 }
 0x1e9   : > { %1612 = vst [vmem:[%s5177_s25 + $0x1e8] sm:$0xff] %v1275_v52  ;;  %1614 = vst [vmem:[%s5177_s25 + $0x1f8] sm:$0xff] %v1468_v46 }
 0x1ed   : > { %v1279_v55 = vpop.f32.mrb[96].mxu0  ;;  %v1472_v50 = vpop.f32.mrb[96].mxu1 }
 0x1ee   : > { %1615 = vst [vmem:[%s5177_s25 + $0x200] sm:$0xff] %v1279_v55  ;;  %v1281_v54 = vpop.f32.mrb[97].mxu0  ;;  %1617 = vst [vmem:[%s5177_s25 + $0x210] sm:$0xff] %v1472_v50  ;;  %v1474_v21 = vpop.f32.mrb[97].mxu1 }
 0x1ef   : > { %1616 = vst [vmem:[%s5177_s25 + $0x208] sm:$0xff] %v1281_v54  ;;  %v1283_v58 = vpop.f32.mrb[98].mxu0  ;;  %1618 = vst [vmem:[%s5177_s25 + $0x218] sm:$0xff] %v1474_v21  ;;  %v1476_v60 = vpop.f32.mrb[98].mxu1 }
 0x1f0   : > { %1619 = vst [vmem:[%s5177_s25 + $0x220] sm:$0xff] %v1283_v58  ;;  %v1285_v61 = vpop.f32.mrb[99].mxu0  ;;  %1621 = vst [vmem:[%s5177_s25 + $0x230] sm:$0xff] %v1476_v60  ;;  %v1478_v53 = vpop.f32.mrb[99].mxu1 }
 0x1f1   : > { %1620 = vst [vmem:[%s5177_s25 + $0x228] sm:$0xff] %v1285_v61  ;;  %1622 = vst [vmem:[%s5177_s25 + $0x238] sm:$0xff] %v1478_v53 }
 0x1f5   : > { %v1289_v62 = vpop.f32.mrb[100].mxu0  ;;  %v1482_v56 = vpop.f32.mrb[100].mxu1 }
 0x1f6   : > { %1623 = vst [vmem:[%s5177_s25 + $0x240] sm:$0xff] %v1289_v62  ;;  %v1291_v1 = vpop.f32.mrb[101].mxu0  ;;  %1625 = vst [vmem:[%s5177_s25 + $0x250] sm:$0xff] %v1482_v56  ;;  %v1484_v57 = vpop.f32.mrb[101].mxu1 }
 0x1f7   : > { %1624 = vst [vmem:[%s5177_s25 + $0x248] sm:$0xff] %v1291_v1  ;;  %v1293_v4 = vpop.f32.mrb[102].mxu0  ;;  %1626 = vst [vmem:[%s5177_s25 + $0x258] sm:$0xff] %v1484_v57  ;;  %v1486_v63 = vpop.f32.mrb[102].mxu1 }
 0x1f8   : > { %1627 = vst [vmem:[%s5177_s25 + $0x260] sm:$0xff] %v1293_v4  ;;  %v1295_v3 = vpop.f32.mrb[103].mxu0  ;;  %1629 = vst [vmem:[%s5177_s25 + $0x270] sm:$0xff] %v1486_v63  ;;  %v1488_v59 = vpop.f32.mrb[103].mxu1 }
 0x1f9   : > { %1628 = vst [vmem:[%s5177_s25 + $0x268] sm:$0xff] %v1295_v3  ;;  %1630 = vst [vmem:[%s5177_s25 + $0x278] sm:$0xff] %v1488_v59 }
 0x1fd   : > { %v1299_v8 = vpop.f32.mrb[104].mxu0  ;;  %v1492_v10 = vpop.f32.mrb[104].mxu1 }
 0x1fe   : > { %1631 = vst [vmem:[%s5177_s25 + $0x280] sm:$0xff] %v1299_v8  ;;  %v1301_v11 = vpop.f32.mrb[105].mxu0  ;;  %1633 = vst [vmem:[%s5177_s25 + $0x290] sm:$0xff] %v1492_v10  ;;  %v1494_v2 = vpop.f32.mrb[105].mxu1 }
 0x1ff   : > { %1632 = vst [vmem:[%s5177_s25 + $0x288] sm:$0xff] %v1301_v11  ;;  %v1303_v12 = vpop.f32.mrb[106].mxu0  ;;  %1634 = vst [vmem:[%s5177_s25 + $0x298] sm:$0xff] %v1494_v2  ;;  %v1496_v13 = vpop.f32.mrb[106].mxu1 }
 0x200   : > { %1635 = vst [vmem:[%s5177_s25 + $0x2a0] sm:$0xff] %v1303_v12  ;;  %v1305_v5 = vpop.f32.mrb[107].mxu0  ;;  %1637 = vst [vmem:[%s5177_s25 + $0x2b0] sm:$0xff] %v1496_v13  ;;  %v1498_v14 = vpop.f32.mrb[107].mxu1 }
 0x201   : > { %1636 = vst [vmem:[%s5177_s25 + $0x2a8] sm:$0xff] %v1305_v5  ;;  %1638 = vst [vmem:[%s5177_s25 + $0x2b8] sm:$0xff] %v1498_v14 }
 0x205   : > { %v1309_v16 = vpop.f32.mrb[108].mxu0  ;;  %v1502_v6 = vpop.f32.mrb[108].mxu1 }
 0x206   : > { %1639 = vst [vmem:[%s5177_s25 + $0x2c0] sm:$0xff] %v1309_v16  ;;  %v1311_v17 = vpop.f32.mrb[109].mxu0  ;;  %1641 = vst [vmem:[%s5177_s25 + $0x2d0] sm:$0xff] %v1502_v6  ;;  %v1504_v9 = vpop.f32.mrb[109].mxu1 }
 0x207   : > { %1640 = vst [vmem:[%s5177_s25 + $0x2c8] sm:$0xff] %v1311_v17  ;;  %v1313_v25 = vpop.f32.mrb[110].mxu0  ;;  %1642 = vst [vmem:[%s5177_s25 + $0x2d8] sm:$0xff] %v1504_v9  ;;  %v1506_v18 = vpop.f32.mrb[110].mxu1 }
 0x208   : > { %1643 = vst [vmem:[%s5177_s25 + $0x2e0] sm:$0xff] %v1313_v25  ;;  %v1315_v27 = vpop.f32.mrb[111].mxu0  ;;  %1645 = vst [vmem:[%s5177_s25 + $0x2f0] sm:$0xff] %v1506_v18  ;;  %v1508_v15 = vpop.f32.mrb[111].mxu1 }
 0x209   : > { %1644 = vst [vmem:[%s5177_s25 + $0x2e8] sm:$0xff] %v1315_v27  ;;  %1646 = vst [vmem:[%s5177_s25 + $0x2f8] sm:$0xff] %v1508_v15 }
 0x20d   : > { %v1319_v28 = vpop.f32.mrb[112].mxu0  ;;  %v1512_v29 = vpop.f32.mrb[112].mxu1 }
 0x20e   : > { %1647 = vst [vmem:[%s5177_s25 + $0x300] sm:$0xff] %v1319_v28  ;;  %v1321_v23 = vpop.f32.mrb[113].mxu0  ;;  %1649 = vst [vmem:[%s5177_s25 + $0x310] sm:$0xff] %v1512_v29  ;;  %v1514_v7 = vpop.f32.mrb[113].mxu1 }
 0x20f   : > { %1648 = vst [vmem:[%s5177_s25 + $0x308] sm:$0xff] %v1321_v23  ;;  %v1323_v31 = vpop.f32.mrb[114].mxu0  ;;  %1650 = vst [vmem:[%s5177_s25 + $0x318] sm:$0xff] %v1514_v7  ;;  %v1516_v24 = vpop.f32.mrb[114].mxu1 }
 0x210   : > { %1651 = vst [vmem:[%s5177_s25 + $0x320] sm:$0xff] %v1323_v31  ;;  %v1325_v32 = vpop.f32.mrb[115].mxu0  ;;  %1653 = vst [vmem:[%s5177_s25 + $0x330] sm:$0xff] %v1516_v24  ;;  %v1518_v26 = vpop.f32.mrb[115].mxu1 }
 0x211   : > { %1652 = vst [vmem:[%s5177_s25 + $0x328] sm:$0xff] %v1325_v32  ;;  %1654 = vst [vmem:[%s5177_s25 + $0x338] sm:$0xff] %v1518_v26 }
 0x215   : > { %v1329_v35 = vpop.f32.mrb[116].mxu0  ;;  %v1522_v19 = vpop.f32.mrb[116].mxu1 }
 0x216   : > { %1655 = vst [vmem:[%s5177_s25 + $0x340] sm:$0xff] %v1329_v35  ;;  %v1331_v22 = vpop.f32.mrb[117].mxu0  ;;  %1657 = vst [vmem:[%s5177_s25 + $0x350] sm:$0xff] %v1522_v19  ;;  %v1524_v30 = vpop.f32.mrb[117].mxu1 }
 0x217   : > { %1656 = vst [vmem:[%s5177_s25 + $0x348] sm:$0xff] %v1331_v22  ;;  %v1333_v37 = vpop.f32.mrb[118].mxu0  ;;  %1658 = vst [vmem:[%s5177_s25 + $0x358] sm:$0xff] %v1524_v30  ;;  %v1526_v39 = vpop.f32.mrb[118].mxu1 }
 0x218   : > { %1659 = vst [vmem:[%s5177_s25 + $0x360] sm:$0xff] %v1333_v37  ;;  %v1335_v33 = vpop.f32.mrb[119].mxu0  ;;  %1661 = vst [vmem:[%s5177_s25 + $0x370] sm:$0xff] %v1526_v39  ;;  %v1528_v40 = vpop.f32.mrb[119].mxu1 }
 0x219   : > { %1660 = vst [vmem:[%s5177_s25 + $0x368] sm:$0xff] %v1335_v33  ;;  %1662 = vst [vmem:[%s5177_s25 + $0x378] sm:$0xff] %v1528_v40 }
 0x21d   : > { %v1339_v42 = vpop.f32.mrb[120].mxu0  ;;  %v1532_v34 = vpop.f32.mrb[120].mxu1 }
 0x21e   : > { %1663 = vst [vmem:[%s5177_s25 + $0x380] sm:$0xff] %v1339_v42  ;;  %v1341_v43 = vpop.f32.mrb[121].mxu0  ;;  %1665 = vst [vmem:[%s5177_s25 + $0x390] sm:$0xff] %v1532_v34  ;;  %v1534_v36 = vpop.f32.mrb[121].mxu1 }
 0x21f   : > { %1664 = vst [vmem:[%s5177_s25 + $0x388] sm:$0xff] %v1341_v43  ;;  %v1343_v45 = vpop.f32.mrb[122].mxu0  ;;  %1666 = vst [vmem:[%s5177_s25 + $0x398] sm:$0xff] %v1534_v36  ;;  %v1536_v20 = vpop.f32.mrb[122].mxu1 }
 0x220   : > { %1667 = vst [vmem:[%s5177_s25 + $0x3a0] sm:$0xff] %v1343_v45  ;;  %v1345_v47 = vpop.f32.mrb[123].mxu0  ;;  %1669 = vst [vmem:[%s5177_s25 + $0x3b0] sm:$0xff] %v1536_v20  ;;  %v1538_v48 = vpop.f32.mrb[123].mxu1 }
 0x221   : > { %1668 = vst [vmem:[%s5177_s25 + $0x3a8] sm:$0xff] %v1345_v47  ;;  %1670 = vst [vmem:[%s5177_s25 + $0x3b8] sm:$0xff] %v1538_v48 }
 0x225   : > { %v1349_v41 = vpop.f32.mrb[124].mxu0  ;;  %v1542_v0 = vpop.f32.mrb[124].mxu1 }
 0x226   : > { %1671 = vst [vmem:[%s5177_s25 + $0x3c0] sm:$0xff] %v1349_v41  ;;  %v1351_v44 = vpop.f32.mrb[125].mxu0  ;;  %1673 = vst [vmem:[%s5177_s25 + $0x3d0] sm:$0xff] %v1542_v0  ;;  %v1544_v49 = vpop.f32.mrb[125].mxu1 }
 0x227   : > { %1672 = vst [vmem:[%s5177_s25 + $0x3c8] sm:$0xff] %v1351_v44  ;;  %v1353_v38 = vpop.f32.mrb[126].mxu0  ;;  %1674 = vst [vmem:[%s5177_s25 + $0x3d8] sm:$0xff] %v1544_v49  ;;  %v1546_v51 = vpop.f32.mrb[126].mxu1 }
 0x228   : > { %1675 = vst [vmem:[%s5177_s25 + $0x3e0] sm:$0xff] %v1353_v38  ;;  %v1355_v52 = vpop.f32.mrb[127].mxu0  ;;  %1677 = vst [vmem:[%s5177_s25 + $0x3f0] sm:$0xff] %v1546_v51  ;;  %v1548_v46 = vpop.f32.mrb[127].mxu1 }
 0x229   : > { %1676 = vst [vmem:[%s5177_s25 + $0x3e8] sm:$0xff] %v1355_v52  ;;  %1678 = vst [vmem:[%s5177_s25 + $0x3f8] sm:$0xff] %v1548_v46 }
 0x22d   : > { %v4025_v55 = vpop.f32.mrb[128].mxu0  ;;  %v4137_v50 = vpop.f32.mrb[128].mxu1 }
 0x22e   : > { %v4026_v54 = vpop.f32.mrb[129].mxu0  ;;  %v4138_v58 = vpop.f32.mrb[129].mxu1 }
 0x22f   : > { %v4027_v21 = vadd.f32 %v4026_v54, %v4025_v55  ;;  %v4028_v60 = vpop.f32.mrb[130].mxu0  ;;  %v4139_v61 = vadd.f32 %v4138_v58, %v4137_v50  ;;  %v4140_v53 = vpop.f32.mrb[130].mxu1 }
 0x230   : > { %v4029_v62 = vpop.f32.mrb[131].mxu0  ;;  %v4141_v1 = vpop.f32.mrb[131].mxu1 }
 0x231   : > { %v4030_v56 = vadd.f32 %v4029_v62, %v4028_v60  ;;  %v2774_v57 = vadd.f32 %v4139_v61, %v4027_v21  ;;  %v4142_v4 = vadd.f32 %v4141_v1, %v4140_v53 }
 0x233   : > { %2901 = vst.msk [vmem:[%s5329_s7] sm:$0xff] %vm2900_vm0, %v2774_v57  ;;  %v2777_v63 = vadd.f32 %v4142_v4, %v4030_v56 }
 0x235   : > { %v4031_v3 = vpop.f32.mrb[132].mxu0  ;;  %2902 = vst.msk [vmem:[%s5329_s7 + $0x8] sm:$0xff] %vm2900_vm0, %v2777_v63  ;;  %v4143_v59 = vpop.f32.mrb[132].mxu1 }
 0x236   : > { %v4032_v8 = vpop.f32.mrb[133].mxu0  ;;  %v4144_v11 = vpop.f32.mrb[133].mxu1 }
 0x237   : > { %v4033_v10 = vadd.f32 %v4032_v8, %v4031_v3  ;;  %v4034_v2 = vpop.f32.mrb[134].mxu0  ;;  %v4145_v12 = vadd.f32 %v4144_v11, %v4143_v59  ;;  %v4146_v13 = vpop.f32.mrb[134].mxu1 }
 0x238   : > { %v4035_v5 = vpop.f32.mrb[135].mxu0  ;;  %v4147_v16 = vpop.f32.mrb[135].mxu1 }
 0x239   : > { %v4036_v14 = vadd.f32 %v4035_v5, %v4034_v2  ;;  %v2782_v6 = vadd.f32 %v4145_v12, %v4033_v10  ;;  %v4148_v17 = vadd.f32 %v4147_v16, %v4146_v13 }
 0x23b   : > { %2903 = vst.msk [vmem:[%s5329_s7 + $0x10] sm:$0xff] %vm2900_vm0, %v2782_v6  ;;  %v2785_v9 = vadd.f32 %v4148_v17, %v4036_v14 }
 0x23d   : > { %v4037_v25 = vpop.f32.mrb[136].mxu0  ;;  %2904 = vst.msk [vmem:[%s5329_s7 + $0x18] sm:$0xff] %vm2900_vm0, %v2785_v9  ;;  %v4149_v18 = vpop.f32.mrb[136].mxu1 }
 0x23e   : > { %v4038_v27 = vpop.f32.mrb[137].mxu0  ;;  %v4150_v28 = vpop.f32.mrb[137].mxu1 }
 0x23f   : > { %v4039_v15 = vadd.f32 %v4038_v27, %v4037_v25  ;;  %v4040_v29 = vpop.f32.mrb[138].mxu0  ;;  %v4151_v23 = vadd.f32 %v4150_v28, %v4149_v18  ;;  %v4152_v7 = vpop.f32.mrb[138].mxu1 }
 0x240   : > { %v4041_v31 = vpop.f32.mrb[139].mxu0  ;;  %v4153_v32 = vpop.f32.mrb[139].mxu1 }
 0x241   : > { %v4042_v24 = vadd.f32 %v4041_v31, %v4040_v29  ;;  %v2790_v26 = vadd.f32 %v4151_v23, %v4039_v15  ;;  %v4154_v35 = vadd.f32 %v4153_v32, %v4152_v7 }
 0x243   : > { %2905 = vst.msk [vmem:[%s5329_s7 + $0x20] sm:$0xff] %vm2900_vm0, %v2790_v26  ;;  %v2793_v19 = vadd.f32 %v4154_v35, %v4042_v24 }
 0x245   : > { %v4043_v22 = vpop.f32.mrb[140].mxu0  ;;  %2906 = vst.msk [vmem:[%s5329_s7 + $0x28] sm:$0xff] %vm2900_vm0, %v2793_v19  ;;  %v4155_v30 = vpop.f32.mrb[140].mxu1 }
 0x246   : > { %v4044_v37 = vpop.f32.mrb[141].mxu0  ;;  %v4156_v33 = vpop.f32.mrb[141].mxu1 }
 0x247   : > { %v4045_v39 = vadd.f32 %v4044_v37, %v4043_v22  ;;  %v4046_v40 = vpop.f32.mrb[142].mxu0  ;;  %v4157_v42 = vadd.f32 %v4156_v33, %v4155_v30  ;;  %v4158_v34 = vpop.f32.mrb[142].mxu1 }
 0x248   : > { %v4047_v43 = vpop.f32.mrb[143].mxu0  ;;  %v4159_v45 = vpop.f32.mrb[143].mxu1 }
 0x249   : > { %v4048_v36 = vadd.f32 %v4047_v43, %v4046_v40  ;;  %v2798_v20 = vadd.f32 %v4157_v42, %v4045_v39  ;;  %v4160_v47 = vadd.f32 %v4159_v45, %v4158_v34 }
 0x24b   : > { %2907 = vst.msk [vmem:[%s5329_s7 + $0x30] sm:$0xff] %vm2900_vm0, %v2798_v20  ;;  %v2801_v48 = vadd.f32 %v4160_v47, %v4048_v36 }
 0x24d   : > { %v4049_v41 = vpop.f32.mrb[144].mxu0  ;;  %2908 = vst.msk [vmem:[%s5329_s7 + $0x38] sm:$0xff] %vm2900_vm0, %v2801_v48  ;;  %v4161_v0 = vpop.f32.mrb[144].mxu1 }
 0x24e   : > { %v4050_v44 = vpop.f32.mrb[145].mxu0  ;;  %v4162_v38 = vpop.f32.mrb[145].mxu1 }
 0x24f   : > { %v4051_v49 = vadd.f32 %v4050_v44, %v4049_v41  ;;  %v4052_v51 = vpop.f32.mrb[146].mxu0  ;;  %v4163_v52 = vadd.f32 %v4162_v38, %v4161_v0  ;;  %v4164_v46 = vpop.f32.mrb[146].mxu1 }
 0x250   : > { %v4053_v55 = vpop.f32.mrb[147].mxu0  ;;  %v4165_v54 = vpop.f32.mrb[147].mxu1 }
 0x251   : > { %v4054_v50 = vadd.f32 %v4053_v55, %v4052_v51  ;;  %v2806_v21 = vadd.f32 %v4163_v52, %v4051_v49  ;;  %v4166_v58 = vadd.f32 %v4165_v54, %v4164_v46 }
 0x253   : > { %2909 = vst.msk [vmem:[%s5329_s7 + $0x40] sm:$0xff] %vm2900_vm0, %v2806_v21  ;;  %v2809_v60 = vadd.f32 %v4166_v58, %v4054_v50 }
 0x255   : > { %v4055_v61 = vpop.f32.mrb[148].mxu0  ;;  %2910 = vst.msk [vmem:[%s5329_s7 + $0x48] sm:$0xff] %vm2900_vm0, %v2809_v60  ;;  %v4167_v53 = vpop.f32.mrb[148].mxu1 }
 0x256   : > { %v4056_v62 = vpop.f32.mrb[149].mxu0  ;;  %v4168_v1 = vpop.f32.mrb[149].mxu1 }
 0x257   : > { %v4057_v56 = vadd.f32 %v4056_v62, %v4055_v61  ;;  %v4058_v57 = vpop.f32.mrb[150].mxu0  ;;  %v4169_v4 = vadd.f32 %v4168_v1, %v4167_v53  ;;  %v4170_v63 = vpop.f32.mrb[150].mxu1 }
 0x258   : > { %v4059_v3 = vpop.f32.mrb[151].mxu0  ;;  %v4171_v8 = vpop.f32.mrb[151].mxu1 }
 0x259   : > { %v4060_v59 = vadd.f32 %v4059_v3, %v4058_v57  ;;  %v2814_v10 = vadd.f32 %v4169_v4, %v4057_v56  ;;  %v4172_v11 = vadd.f32 %v4171_v8, %v4170_v63 }
 0x25b   : > { %2911 = vst.msk [vmem:[%s5329_s7 + $0x50] sm:$0xff] %vm2900_vm0, %v2814_v10  ;;  %v2817_v2 = vadd.f32 %v4172_v11, %v4060_v59 }
 0x25d   : > { %v4061_v12 = vpop.f32.mrb[152].mxu0  ;;  %2912 = vst.msk [vmem:[%s5329_s7 + $0x58] sm:$0xff] %vm2900_vm0, %v2817_v2  ;;  %v4173_v13 = vpop.f32.mrb[152].mxu1 }
 0x25e   : > { %v4062_v5 = vpop.f32.mrb[153].mxu0  ;;  %v4174_v16 = vpop.f32.mrb[153].mxu1 }
 0x25f   : > { %v4063_v14 = vadd.f32 %v4062_v5, %v4061_v12  ;;  %v4064_v6 = vpop.f32.mrb[154].mxu0  ;;  %v4175_v17 = vadd.f32 %v4174_v16, %v4173_v13  ;;  %v4176_v9 = vpop.f32.mrb[154].mxu1 }
 0x260   : > { %v4065_v25 = vpop.f32.mrb[155].mxu0  ;;  %v4177_v27 = vpop.f32.mrb[155].mxu1 }
 0x261   : > { %v4066_v18 = vadd.f32 %v4065_v25, %v4064_v6  ;;  %v2822_v15 = vadd.f32 %v4175_v17, %v4063_v14  ;;  %v4178_v28 = vadd.f32 %v4177_v27, %v4176_v9 }
 0x263   : > { %2913 = vst.msk [vmem:[%s5329_s7 + $0x60] sm:$0xff] %vm2900_vm0, %v2822_v15  ;;  %v2825_v29 = vadd.f32 %v4178_v28, %v4066_v18 }
 0x265   : > { %v4067_v23 = vpop.f32.mrb[156].mxu0  ;;  %2914 = vst.msk [vmem:[%s5329_s7 + $0x68] sm:$0xff] %vm2900_vm0, %v2825_v29  ;;  %v4179_v7 = vpop.f32.mrb[156].mxu1 }
 0x266   : > { %v4068_v31 = vpop.f32.mrb[157].mxu0  ;;  %v4180_v32 = vpop.f32.mrb[157].mxu1 }
 0x267   : > { %v4069_v24 = vadd.f32 %v4068_v31, %v4067_v23  ;;  %v4070_v26 = vpop.f32.mrb[158].mxu0  ;;  %v4181_v35 = vadd.f32 %v4180_v32, %v4179_v7  ;;  %v4182_v19 = vpop.f32.mrb[158].mxu1 }
 0x268   : > { %v4071_v22 = vpop.f32.mrb[159].mxu0  ;;  %v4183_v37 = vpop.f32.mrb[159].mxu1 }
 0x269   : > { %v4072_v30 = vadd.f32 %v4071_v22, %v4070_v26  ;;  %v2830_v39 = vadd.f32 %v4181_v35, %v4069_v24  ;;  %v4184_v33 = vadd.f32 %v4183_v37, %v4182_v19 }
 0x26b   : > { %2915 = vst.msk [vmem:[%s5329_s7 + $0x70] sm:$0xff] %vm2900_vm0, %v2830_v39  ;;  %v2833_v40 = vadd.f32 %v4184_v33, %v4072_v30 }
 0x26d   : > { %v4073_v42 = vpop.f32.mrb[160].mxu0  ;;  %2916 = vst.msk [vmem:[%s5329_s7 + $0x78] sm:$0xff] %vm2900_vm0, %v2833_v40  ;;  %v4185_v34 = vpop.f32.mrb[160].mxu1 }
 0x26e   : > { %v4074_v43 = vpop.f32.mrb[161].mxu0  ;;  %v4186_v45 = vpop.f32.mrb[161].mxu1 }
 0x26f   : > { %v4075_v36 = vadd.f32 %v4074_v43, %v4073_v42  ;;  %v4076_v20 = vpop.f32.mrb[162].mxu0  ;;  %v4187_v47 = vadd.f32 %v4186_v45, %v4185_v34  ;;  %v4188_v48 = vpop.f32.mrb[162].mxu1 }
 0x270   : > { %v4077_v41 = vpop.f32.mrb[163].mxu0  ;;  %v4189_v44 = vpop.f32.mrb[163].mxu1 }
 0x271   : > { %v4078_v0 = vadd.f32 %v4077_v41, %v4076_v20  ;;  %v2838_v49 = vadd.f32 %v4187_v47, %v4075_v36  ;;  %v4190_v38 = vadd.f32 %v4189_v44, %v4188_v48 }
 0x273   : > { %2917 = vst.msk [vmem:[%s5329_s7 + $0x80] sm:$0xff] %vm2900_vm0, %v2838_v49  ;;  %v2841_v51 = vadd.f32 %v4190_v38, %v4078_v0 }
 0x275   : > { %v4079_v52 = vpop.f32.mrb[164].mxu0  ;;  %2918 = vst.msk [vmem:[%s5329_s7 + $0x88] sm:$0xff] %vm2900_vm0, %v2841_v51  ;;  %v4191_v46 = vpop.f32.mrb[164].mxu1 }
 0x276   : > { %v4080_v55 = vpop.f32.mrb[165].mxu0  ;;  %v4192_v54 = vpop.f32.mrb[165].mxu1 }
 0x277   : > { %v4081_v50 = vadd.f32 %v4080_v55, %v4079_v52  ;;  %v4082_v21 = vpop.f32.mrb[166].mxu0  ;;  %v4193_v58 = vadd.f32 %v4192_v54, %v4191_v46  ;;  %v4194_v60 = vpop.f32.mrb[166].mxu1 }
 0x278   : > { %v4083_v61 = vpop.f32.mrb[167].mxu0  ;;  %v4195_v62 = vpop.f32.mrb[167].mxu1 }
 0x279   : > { %v4084_v53 = vadd.f32 %v4083_v61, %v4082_v21  ;;  %v2846_v56 = vadd.f32 %v4193_v58, %v4081_v50  ;;  %v4196_v1 = vadd.f32 %v4195_v62, %v4194_v60 }
 0x27b   : > { %2919 = vst.msk [vmem:[%s5329_s7 + $0x90] sm:$0xff] %vm2900_vm0, %v2846_v56  ;;  %v2849_v57 = vadd.f32 %v4196_v1, %v4084_v53 }
 0x27d   : > { %v4085_v4 = vpop.f32.mrb[168].mxu0  ;;  %2920 = vst.msk [vmem:[%s5329_s7 + $0x98] sm:$0xff] %vm2900_vm0, %v2849_v57  ;;  %v4197_v63 = vpop.f32.mrb[168].mxu1 }
 0x27e   : > { %v4086_v3 = vpop.f32.mrb[169].mxu0  ;;  %v4198_v8 = vpop.f32.mrb[169].mxu1 }
 0x27f   : > { %v4087_v59 = vadd.f32 %v4086_v3, %v4085_v4  ;;  %v4088_v10 = vpop.f32.mrb[170].mxu0  ;;  %v4199_v11 = vadd.f32 %v4198_v8, %v4197_v63  ;;  %v4200_v2 = vpop.f32.mrb[170].mxu1 }
 0x280   : > { %v4089_v12 = vpop.f32.mrb[171].mxu0  ;;  %v4201_v5 = vpop.f32.mrb[171].mxu1 }
 0x281   : > { %v4090_v13 = vadd.f32 %v4089_v12, %v4088_v10  ;;  %v2854_v14 = vadd.f32 %v4199_v11, %v4087_v59  ;;  %v4202_v16 = vadd.f32 %v4201_v5, %v4200_v2 }
 0x283   : > { %2921 = vst.msk [vmem:[%s5329_s7 + $0xa0] sm:$0xff] %vm2900_vm0, %v2854_v14  ;;  %v2857_v6 = vadd.f32 %v4202_v16, %v4090_v13 }
 0x285   : > { %v4091_v17 = vpop.f32.mrb[172].mxu0  ;;  %2922 = vst.msk [vmem:[%s5329_s7 + $0xa8] sm:$0xff] %vm2900_vm0, %v2857_v6  ;;  %v4203_v9 = vpop.f32.mrb[172].mxu1 }
 0x286   : > { %v4092_v25 = vpop.f32.mrb[173].mxu0  ;;  %v4204_v27 = vpop.f32.mrb[173].mxu1 }
 0x287   : > { %v4093_v18 = vadd.f32 %v4092_v25, %v4091_v17  ;;  %v4094_v15 = vpop.f32.mrb[174].mxu0  ;;  %v4205_v28 = vadd.f32 %v4204_v27, %v4203_v9  ;;  %v4206_v29 = vpop.f32.mrb[174].mxu1 }
 0x288   : > { %v4095_v23 = vpop.f32.mrb[175].mxu0  ;;  %v4207_v31 = vpop.f32.mrb[175].mxu1 }
 0x289   : > { %v4096_v7 = vadd.f32 %v4095_v23, %v4094_v15  ;;  %v2862_v24 = vadd.f32 %v4205_v28, %v4093_v18  ;;  %v4208_v32 = vadd.f32 %v4207_v31, %v4206_v29 }
 0x28b   : > { %2923 = vst.msk [vmem:[%s5329_s7 + $0xb0] sm:$0xff] %vm2900_vm0, %v2862_v24  ;;  %v2865_v26 = vadd.f32 %v4208_v32, %v4096_v7 }
 0x28d   : > { %v4097_v35 = vpop.f32.mrb[176].mxu0  ;;  %2924 = vst.msk [vmem:[%s5329_s7 + $0xb8] sm:$0xff] %vm2900_vm0, %v2865_v26  ;;  %v4209_v19 = vpop.f32.mrb[176].mxu1 }
 0x28e   : > { %v4098_v22 = vpop.f32.mrb[177].mxu0  ;;  %v4210_v37 = vpop.f32.mrb[177].mxu1 }
 0x28f   : > { %v4099_v30 = vadd.f32 %v4098_v22, %v4097_v35  ;;  %v4100_v39 = vpop.f32.mrb[178].mxu0  ;;  %v4211_v33 = vadd.f32 %v4210_v37, %v4209_v19  ;;  %v4212_v40 = vpop.f32.mrb[178].mxu1 }
 0x290   : > { %v4101_v42 = vpop.f32.mrb[179].mxu0  ;;  %v4213_v43 = vpop.f32.mrb[179].mxu1 }
 0x291   : > { %v4102_v34 = vadd.f32 %v4101_v42, %v4100_v39  ;;  %v2870_v36 = vadd.f32 %v4211_v33, %v4099_v30  ;;  %v4214_v45 = vadd.f32 %v4213_v43, %v4212_v40 }
 0x293   : > { %2925 = vst.msk [vmem:[%s5329_s7 + $0xc0] sm:$0xff] %vm2900_vm0, %v2870_v36  ;;  %v2873_v20 = vadd.f32 %v4214_v45, %v4102_v34 }
 0x295   : > { %v4103_v47 = vpop.f32.mrb[180].mxu0  ;;  %2926 = vst.msk [vmem:[%s5329_s7 + $0xc8] sm:$0xff] %vm2900_vm0, %v2873_v20  ;;  %v4215_v48 = vpop.f32.mrb[180].mxu1 }
 0x296   : > { %v4104_v41 = vpop.f32.mrb[181].mxu0  ;;  %v4216_v44 = vpop.f32.mrb[181].mxu1 }
 0x297   : > { %v4105_v0 = vadd.f32 %v4104_v41, %v4103_v47  ;;  %v4106_v49 = vpop.f32.mrb[182].mxu0  ;;  %v4217_v38 = vadd.f32 %v4216_v44, %v4215_v48  ;;  %v4218_v51 = vpop.f32.mrb[182].mxu1 }
 0x298   : > { %v4107_v52 = vpop.f32.mrb[183].mxu0  ;;  %v4219_v55 = vpop.f32.mrb[183].mxu1 }
 0x299   : > { %v4108_v46 = vadd.f32 %v4107_v52, %v4106_v49  ;;  %v2878_v50 = vadd.f32 %v4217_v38, %v4105_v0  ;;  %v4220_v54 = vadd.f32 %v4219_v55, %v4218_v51 }
 0x29b   : > { %2927 = vst.msk [vmem:[%s5329_s7 + $0xd0] sm:$0xff] %vm2900_vm0, %v2878_v50  ;;  %v2881_v21 = vadd.f32 %v4220_v54, %v4108_v46 }
 0x29d   : > { %v4109_v58 = vpop.f32.mrb[184].mxu0  ;;  %2928 = vst.msk [vmem:[%s5329_s7 + $0xd8] sm:$0xff] %vm2900_vm0, %v2881_v21  ;;  %v4221_v60 = vpop.f32.mrb[184].mxu1 }
 0x29e   : > { %v4110_v61 = vpop.f32.mrb[185].mxu0  ;;  %v4222_v62 = vpop.f32.mrb[185].mxu1 }
 0x29f   : > { %v4111_v53 = vadd.f32 %v4110_v61, %v4109_v58  ;;  %v4112_v56 = vpop.f32.mrb[186].mxu0  ;;  %v4223_v1 = vadd.f32 %v4222_v62, %v4221_v60  ;;  %v4224_v57 = vpop.f32.mrb[186].mxu1 }
 0x2a0   : > { %v4113_v4 = vpop.f32.mrb[187].mxu0  ;;  %v4225_v3 = vpop.f32.mrb[187].mxu1 }
 0x2a1   : > { %v4114_v63 = vadd.f32 %v4113_v4, %v4112_v56  ;;  %v2886_v59 = vadd.f32 %v4223_v1, %v4111_v53  ;;  %v4226_v8 = vadd.f32 %v4225_v3, %v4224_v57 }
 0x2a3   : > { %2929 = vst.msk [vmem:[%s5329_s7 + $0xe0] sm:$0xff] %vm2900_vm0, %v2886_v59  ;;  %v2889_v10 = vadd.f32 %v4226_v8, %v4114_v63 }
 0x2a5   : > { %v4115_v11 = vpop.f32.mrb[188].mxu0  ;;  %2930 = vst.msk [vmem:[%s5329_s7 + $0xe8] sm:$0xff] %vm2900_vm0, %v2889_v10  ;;  %v4227_v2 = vpop.f32.mrb[188].mxu1 }
 0x2a6   : > { %v4116_v12 = vpop.f32.mrb[189].mxu0  ;;  %v4228_v5 = vpop.f32.mrb[189].mxu1 }
 0x2a7   : > { %v4117_v13 = vadd.f32 %v4116_v12, %v4115_v11  ;;  %v4118_v14 = vpop.f32.mrb[190].mxu0  ;;  %v4229_v16 = vadd.f32 %v4228_v5, %v4227_v2  ;;  %v4230_v6 = vpop.f32.mrb[190].mxu1 }
 0x2a8   : > { %v4119_v17 = vpop.f32.mrb[191].mxu0  ;;  %v4231_v25 = vpop.f32.mrb[191].mxu1 }
 0x2a9   : > { %v4120_v9 = vadd.f32 %v4119_v17, %v4118_v14  ;;  %v2894_v18 = vadd.f32 %v4229_v16, %v4117_v13  ;;  %v4232_v27 = vadd.f32 %v4231_v25, %v4230_v6 }
 0x2ab   : > { %2931 = vst.msk [vmem:[%s5329_s7 + $0xf0] sm:$0xff] %vm2900_vm0, %v2894_v18  ;;  %v2897_v15 = vadd.f32 %v4232_v27, %v4120_v9 }
 0x2ad   : > { %2932 = vst.msk [vmem:[%s5329_s7 + $0xf8] sm:$0xff] %vm2900_vm0, %v2897_v15 }
 0x2ae   : > { %s3623_s10 = sshll.u32 %s4519_s22, 11  ;;  %s2973_s11 = sshll.u32 %s4860_s17, 4  ;;  %s2974_s11 = int_to_ptr.vmem [resolvable:$true] %s2973_s11 }
 0x2af   : > { %s2956_s14 = scalar_lea.hbm %s5468_s3, %s3623_s10  ;;  %s4458_s16 = smov 2048  }
 0x2b0   : > { %p5482_p6 = scmp.ne.s32.totalorder %s5474_s28, 0  ;;  %s4459_s23 = smov 4096  }
 0x2b1   : > { %s4460_s26 = smov 32   ;;  %s4461_s8 = smov 64  }
 0x2b2   : > { %4237 = sst [smem:[#allocation9]] (%p5482_p6), %s4458_s16  ;;  %s4462_s17 = smov 4  }
 0x2b3   : > { %4238 = sst [smem:[#allocation9 + $0x1]] (%p5482_p6), %s4459_s23  ;;  %s4463_s30 = smov [#allocation8]  }
 0x2b4   : > { %4239 = sst [smem:[#allocation9 + $0x2]] (%p5482_p6), %s4460_s26  ;;  %s4464_s7 = smov 0  }
 0x2b5   : > { %4240 = sst [smem:[#allocation9 + $0x3]] (%p5482_p6), %s4461_s8  ;;  %s3625_s10 = sshll.u32 %s4519_s22, 14 }
 0x2b6   : > { %4241 = sst [smem:[#allocation9 + $0x4]] (%p5482_p6), %s4461_s8  ;;  %s3003_s12 = sshll.u32 %s5177_s25, 4  ;;  %s5423_s12 = int_to_ptr.vmem [resolvable:$true] %s3003_s12 }
 0x2b7   : > { %4242 = sst [smem:[#allocation9 + $0x5]] (%p5482_p6), %s4462_s17  ;;  %s5421_s23 = scalar_lea.hbm %s5469_s4, %s3625_s10 }
 0x2b8   : > { %4243 = dma.general (%p5482_p6), %s2974_s11, 8192, %s2956_s14, %s2934_s6, %s4463_s30, [#allocation9], %s4464_s7, 0  }
 0x2b9   : > { %s4382_s26 = scalar_lea.vmem %s5423_s12, 16384  ;;  %s4465_s6 = smov [#allocation6]  }
 0x2ba   : > { %p4383_p9 = scmp.ne.s32.totalorder %s5423_s12, %s4382_s26  ;;  %s4386_s11 = sshll.u32 %s4465_s6, 4  ;;  %s4387_s11 = int_to_ptr.vmem [resolvable:$false] %s4386_s11 }
 0x2bb   : > { %s4388_s22 = scalar_lea.vmem %s4387_s11, 32768  ;;  %p4389_p2 = scmp.lt.s32.totalorder %s5423_s12, %s4387_s11 }
 0x2bc   : > { %p4384_p10 = pnand %p4383_p9, %p5482_p6  ;;  %p4390_p3 = scmp.lt.s32.totalorder %s4388_s22, %s4382_s26 }
 0x2be   : > { %p4385_p12 = pneg %p4384_p10  ;;  %p4391_p4 = por %p4390_p3, %p4389_p2 }
 0x2c0   : > { %p4392_p7 = pnand %p4391_p4, %p4385_p12 }
 0x2c2   : > { %4395 = shalt.err (!%p4392_p7)
}
 0x2c3   : > { %s4396_s25 = scalar_lea.hbm %s5421_s23, 16384  ;;  %s4400_s17 = scalar_lea.hbm %s5469_s4, 32768 }
 0x2c4   : > { %p4397_p8 = scmp.ne.s32.totalorder %s5421_s23, %s4396_s25  ;;  %p4401_p1 = scmp.lt.u32.totalorder %s5421_s23, %s5469_s4 }
 0x2c5   : > { %p4402_p0 = scmp.lt.u32.totalorder %s4400_s17, %s4396_s25  ;;  %p4404_p9 = scmp.lt.u32.totalorder %s4396_s25, %s5421_s23 }
 0x2c6   : > { %p4398_p11 = pnand %p4397_p8, %p5482_p6 }
 0x2c7   : > { %p4403_p5 = por %p4402_p0, %p4401_p1 }
 0x2c8   : > { %p4399_p13 = pneg %p4398_p11 }
 0x2c9   : > { %p4405_p10 = por %p4404_p9, %p4403_p5 }
 0x2cb   : > { %p4406_p12 = pnand %p4405_p10, %p4399_p13 }
 0x2cd   : > { %4409 = shalt.err (!%p4406_p12)
}
 0x2ce   : > { %s4466_s10 = smov 512   ;;  %s4467_s13 = smov 32  }
 0x2cf   : > { %4244 = dma.vmem_to_hbm [thread:$0]  (%p5482_p6), %s5423_s12, 16384, %s5421_s23, %s2939_s9, %s4466_s10, %s4466_s10, %s4467_s13  }
 0x2d0 PF: > { %p4260_p2 = scmp.ge.s32.totalorder %s4452_s21, 2  ;;  %s3022_s16 = sand.u32 1, %s4440_s18  }
 0x2d1   : > { %p5483_p3 = scmp.ne.s32.totalorder %s5475_s29, 0  ;;  %s3023_s26 = scalar_lea.sflag [#allocation4], %s3022_s16 }
 0x2d3   : > { %p4252_p4 = pnand %p4260_p2, %p5483_p3 }
 0x2d5   : > { %4431 = dma.done.wait (!%p4252_p4), %s3023_s26, 8192  }
 0x2d6   : > { %4433 = vsyncadd (!%p4252_p4), %s3023_s26, 4294959104  ;;  %s3032_s6 = scalar_lea.sflag [#allocation7], %s3022_s16 }
 0x2d7   : > { %4435 = dma.done.wait (!%p4252_p4), %s3032_s6, 16384  }
 0x2d8   : > { %4437 = vsyncadd (!%p4252_p4), %s3032_s6, 4294950912  ;;  %p20_p6 = scmp.ge.s32.totalorder %s4523_s24, 4   ;;  %s5484_s18 = smov %s4444_s19 }
 0x2d9   : > { %s5485_s19 = smov %s4448_s20  ;;  %s5486_s20 = smov %s4534_s27 }
 0x2da   : > { %s5487_s21 = smov %s4523_s24  ;;  %22 = sbr.rel (!%p20_p6) target bundleno = 6 (0x6), region = 109 }
 0x2e1   :  { %3045 = vsyncpa [#allocation3], 1 }
 0x2e2   :  { %3047 = vsyncpa [#allocation3 + $0x1], 1 }
 0x2e3   :  { %3048 = vsyncpa [#allocation4], 1 }
 0x2e4   :  { %3050 = vsyncpa [#allocation4 + $0x1], 1 }
 0x2e5   :  { %3051 = vsyncpa [#allocation7], 1 }
 0x2e6   :  { %3053 = vsyncpa [#allocation7 + $0x1], 1 }

</bundles_post_ra>
